<compile_context>
chip_gen: v6e
topology: v6e:2x2x1
jax: 0.10.0
libtpu: 0.0.40
codegen_flags: <defaults>
</compile_context>

<pallas_src>
import functools

import numpy as np
import jax
import jax.numpy as jnp
from jax.experimental import pallas as pl
from jax.experimental.pallas import tpu as pltpu

ALPHA = 0.5        # NOTE: `alpha` is an undefined module-level global in the reference; fixed here.
NEG_SLOPE = 0.01   # F.leaky_relu default negative_slope


# ----------------------------------------------------------------------------
# Constant lattice-convolution tensors (exact port of the PyTorch builders)
# ----------------------------------------------------------------------------
def build_join_convolve_tensor(signal_dim, kernel_dim, kernel_loc):
    M = np.zeros((signal_dim, signal_dim, kernel_dim), dtype=np.float32)
    for i in range(signal_dim):
        for j in range(i, signal_dim):
            for k in range(kernel_dim):
                if i == max(j, k + kernel_loc):
                    M[i, j, k] = 1.0
    return M


def build_meet_convolve_tensor(signal_dim, kernel_dim, kernel_loc):
    M = np.zeros((signal_dim, signal_dim, kernel_dim), dtype=np.float32)
    for i in range(signal_dim):
        for j in range(i, signal_dim):
            for k in range(kernel_dim):
                if i == min(j, k + kernel_loc):
                    M[i, j, k] = 1.0
    return M


def _fuse_conv_tensors(cx, cy):
    # C[a, b, i*Sy + j, x*Sy + y] = cx[i, x, a] * cy[j, y, b]
    sx, _, kx = cx.shape
    sy, _, ky = cy.shape
    return np.einsum('ixa,jyb->abijxy', cx, cy).reshape(kx, ky, sx * sy, sx * sy)


def make_layer_params(key, signal_dim, kernel_dim, f_in, f_out, *, alpha=ALPHA,
                      weight_dtype=jnp.bfloat16):
    sx, sy = signal_dim
    kx, ky = kernel_dim
    S = sx * sy

    # LatticeCNN: meet kernel_loc = (sx-kx, sy-ky), join kernel_loc = (0, 0)
    cmx = build_meet_convolve_tensor(sx, kx, sx - kx)
    cmy = build_meet_convolve_tensor(sy, ky, sy - ky)
    cjx = build_join_convolve_tensor(sx, kx, 0)
    cjy = build_join_convolve_tensor(sy, ky, 0)
    c_meet = jnp.asarray(_fuse_conv_tensors(cmx, cmy))   # (kx, ky, S, S)
    c_join = jnp.asarray(_fuse_conv_tensors(cjx, cjy))   # (kx, ky, S, S)

    k1, k2 = jax.random.split(key)
    # kaiming_normal_-style deterministic init; bias zero-init.
    std = float(np.sqrt(2.0 / (ky * f_in * f_out)))
    W_meet = std * jax.random.normal(k1, (kx, ky, f_in, f_out), jnp.float32)
    W_join = std * jax.random.normal(k2, (kx, ky, f_in, f_out), jnp.float32)
    b_meet = jnp.zeros((f_out,), jnp.float32)
    b_join = jnp.zeros((f_out,), jnp.float32)

    # ---- Fused layer operator (wrapper-side, done once) ----
    # A_eff[(f,s),(g,t)] = sum_{a,b} ((1-a)*C_meet[a,b,s,t]*W_meet[a,b,f,g]
    #                                 +   a *C_join[a,b,s,t]*W_join[a,b,f,g])
    A_meet = jnp.einsum('abfg,abst->fsgt', W_meet, c_meet).reshape(f_in * S, f_out * S)
    A_join = jnp.einsum('abfg,abst->fsgt', W_join, c_join).reshape(f_in * S, f_out * S)
    A_eff = ((1.0 - alpha) * A_meet + alpha * A_join).astype(weight_dtype)       # (F*S, G*S) bf16
    b_eff = (1.0 - alpha) * b_meet + alpha * b_join                              # (G,) f32
    b_eff = jnp.broadcast_to(b_eff[:, None], (f_out, S)).reshape(1, f_out * S)   # lane-dense f32

    return dict(
        f_in=f_in, f_out=f_out, S=S,
        # exact-reference tensors (pure-JAX check only):
        cmx=jnp.asarray(cmx), cmy=jnp.asarray(cmy),
        cjx=jnp.asarray(cjx), cjy=jnp.asarray(cjy),
        W_meet=W_meet, W_join=W_join, b_meet=b_meet, b_join=b_join,
        # fused operator used by the kernel:
        A_eff=A_eff, b_eff=b_eff,
    )


# ----------------------------------------------------------------------------
# Pallas kernel: whole LatticeCNN forward for one M tile, all layers fused.
# refs = (x_ref, A1_ref, b1_ref, A2_ref, b2_ref, ..., o_ref)
# ----------------------------------------------------------------------------
def lattice_net_kernel(*refs, n_layers, slope):
    x_ref = refs[0]
    o_ref = refs[-1]
    h = x_ref[...].astype(jnp.float32)                         # (TM, F0*S) lane-dense
    for l in range(n_layers):                                  # static unroll over layers
        a_ref = refs[1 + 2 * l]                                # (F_l*S, F_{l+1}*S) bf16
        b_ref = refs[2 + 2 * l]                                # (1,   F_{l+1}*S)   f32
        h = jnp.dot(h.astype(a_ref.dtype), a_ref[...],
                    preferred_element_type=jnp.float32) + b_ref[...]
        h = jnp.where(h >= 0.0, h, slope * h)                  # leaky_relu (f32 VPU epilogue)
    o_ref[...] = h.astype(o_ref.dtype)


def _round_up(v, m):
    return ((v + m - 1) // m) * m


def lattice_cnn_forward(x, layers, *, slope=NEG_SLOPE, tm_target=256):
    # x: (M, C, Sx, Sy) NCHW, same as the PyTorch module.
    M, F0, sx, sy = x.shape
    S = sx * sy
    G = layers[-1]['f_out']
    FS_in = F0 * S
    FS_out = G * S

    # --- M tiling: pad batch to fill sublanes / MXU rows and enable pipelining ---
    M_pad = _round_up(max(M, 8), 8)
    if M_pad >= tm_target:
        TM = tm_target
    else:
        TM = M_pad                                   # single tile covering the padded batch

    # Cap TM so (live f32 activation + double-buffered x/out tiles + weights) fits VMEM.
    max_fs = max([FS_in] + [p['f_out'] * S for p in layers])
    w_bytes = sum(int(p['A_eff'].size) * p['A_eff'].dtype.itemsize
                  + int(p['b_eff'].size) * 4 for p in layers)

    def _est_bytes(tm):
        act = tm * max_fs * 4                        # live f32 inter-layer activation
        io = 2 * tm * (FS_in + FS_out) * 4           # double-buffered x / out tiles
        return act + io + 2 * w_bytes                # worst case: weights double-buffered

    vmem_budget = 24 * 1024 * 1024
    while TM > 8 and _est_bytes(TM) > vmem_budget:
        TM = max(8, _round_up(TM // 2, 8))
    M_pad = _round_up(M_pad, TM)
    n_tiles = M_pad // TM

    x_flat = x.reshape(M, FS_in)                     # index f*S + (i*Sy + j)
    if M_pad != M:
        x_flat = jnp.pad(x_flat, ((0, M_pad - M), (0, 0)))

    args = [x_flat]
    for p in layers:
        args.append(p['A_eff'])
        args.append(p['b_eff'])

    kernel = functools.partial(lattice_net_kernel, n_layers=len(layers), slope=slope)

    flops = int(2 * M_pad * sum(p['f_in'] * S * p['f_out'] * S for p in layers))
    bytes_accessed = int(M_pad * (FS_in + FS_out) * 4 + w_bytes)
    cost = pl.CostEstimate(flops=flops, transcendentals=0, bytes_accessed=bytes_accessed)
    vmem_limit = int(min(100 * 1024 * 1024, max(32 * 1024 * 1024, 2 * _est_bytes(TM))))

    def _build_and_run(single_buffer_weights):
        def wspec(arr):
            idx = lambda i: (0,) * arr.ndim          # grid-invariant -> VMEM-resident
            if single_buffer_weights:
                return pl.BlockSpec(arr.shape, idx, pipeline_mode=pl.Buffered(1))
            return pl.BlockSpec(arr.shape, idx)

        in_specs = [pl.BlockSpec((TM, FS_in), lambda i: (i, 0))]
        for p in layers:
            in_specs.append(wspec(p['A_eff']))
            in_specs.append(wspec(p['b_eff']))
        out_spec = pl.BlockSpec((TM, FS_out), lambda i: (i, 0))

        return pl.pallas_call(
            kernel,
            out_shape=jax.ShapeDtypeStruct((M_pad, FS_out), x.dtype),
            grid=(n_tiles,),
            in_specs=in_specs,
            out_specs=out_spec,
            compiler_params=pltpu.CompilerParams(
                dimension_semantics=("parallel",),   # megacore sharding of M tiles (v7x)
                vmem_limit_bytes=vmem_limit),
            cost_estimate=cost,
        )(*args)

    try:
        # Single-buffer the grid-invariant operators: their block index never changes, so a
        # second pipeline buffer is pure VMEM waste (matters on v7x's 64 MiB VMEM).
        out = jax.block_until_ready(_build_and_run(True))
    except Exception:
        # pipeline_mode=pl.Buffered(1) unsupported on this jax version -> default buffering.
        out = jax.block_until_ready(_build_and_run(False))

    out = out[:M]
    return out.reshape(M, G, sx, sy)


# ----------------------------------------------------------------------------
# Pure-JAX reference (direct transcription of the PyTorch forward, f32)
# ----------------------------------------------------------------------------
def reference_forward(x, layers):
    h = x
    for p in layers:
        ym = jnp.einsum('ixa,jyb,mfij,abfg->mgxy', p['cmx'], p['cmy'], h, p['W_meet']) \
            + p['b_meet'].reshape(1, -1, 1, 1)
        yj = jnp.einsum('ixa,jyb,mfij,abfg->mgxy', p['cjx'], p['cjy'], h, p['W_join']) \
            + p['b_join'].reshape(1, -1, 1, 1)
        z = (1.0 - ALPHA) * ym + ALPHA * yj
        h = jnp.where(z >= 0.0, z, NEG_SLOPE * z)
    return h


if __name__ == "__main__":
    signal_dim = (8, 8)
    kernel_dim = (3, 3)
    n_features = [4, 8, 4]
    batch = 2

    key = jax.random.PRNGKey(0)
    kx_in, kparams = jax.random.split(key)
    x = jax.random.normal(kx_in, (batch, n_features[0], signal_dim[0], signal_dim[1]),
                          jnp.float32)

    layer_keys = jax.random.split(kparams, len(n_features) - 1)
    layers = [make_layer_params(layer_keys[l], signal_dim, kernel_dim,
                                n_features[l], n_features[l + 1])
              for l in range(len(n_features) - 1)]

    # Small-batch path (batch padded to 8 sublane rows, single M tile).
    y = lattice_cnn_forward(x, layers)
    y = jax.block_until_ready(y)
    y_ref = reference_forward(x, layers)
    scale = float(jnp.max(jnp.abs(y_ref))) + 1e-6
    err = float(jnp.max(jnp.abs(y - y_ref)))
    # bf16 MXU inputs -> relative tolerance (was 1e-4 absolute with f32 operands).
    assert err <= 5e-2 * scale, f"mismatch vs reference: max abs err {err} (scale {scale})"

    # Multi-tile path: grid > 1 over M, plus batch padding + slice-off.
    xb = jax.random.normal(jax.random.PRNGKey(1),
                           (40, n_features[0], signal_dim[0], signal_dim[1]), jnp.float32)
    yb = jax.block_until_ready(lattice_cnn_forward(xb, layers, tm_target=16))
    yb_ref = reference_forward(xb, layers)
    scale_b = float(jnp.max(jnp.abs(yb_ref))) + 1e-6
    err_b = float(jnp.max(jnp.abs(yb - yb_ref)))
    assert err_b <= 5e-2 * scale_b, f"batched mismatch: max abs err {err_b} (scale {scale_b})"

    print("KERNEL_OK")
</pallas_src>

<mosaic_0001>
module attributes {stable_mosaic.version = 11 : i64} {
  func.func @lattice_net_kernel(%arg0: i32, %arg1: memref<8x256xf32, #tpu.memory_space<vmem>>, %arg2: memref<256x512xbf16, #tpu.memory_space<vmem>>, %arg3: memref<1x512xf32, #tpu.memory_space<vmem>>, %arg4: memref<512x256xbf16, #tpu.memory_space<vmem>>, %arg5: memref<1x256xf32, #tpu.memory_space<vmem>>, %arg6: memref<8x256xf32, #tpu.memory_space<vmem>>) attributes {dimension_semantics = [#tpu.dimension_semantics<parallel>], iteration_bounds = array<i64: 1>, scalar_prefetch = 0 : i64, scratch_operands = 0 : i64, tpu.core_type = #tpu.core_type<tc>, window_params = [{transform_indices = @transform_0, window_bounds = array<i64: 8, 256>}, {pipeline_mode = #tpu.pipeline_mode<synchronous>, transform_indices = @transform_1, window_bounds = array<i64: 256, 512>}, {pipeline_mode = #tpu.pipeline_mode<synchronous>, transform_indices = @transform_2, window_bounds = array<i64: 1, 512>}, {pipeline_mode = #tpu.pipeline_mode<synchronous>, transform_indices = @transform_3, window_bounds = array<i64: 512, 256>}, {pipeline_mode = #tpu.pipeline_mode<synchronous>, transform_indices = @transform_4, window_bounds = array<i64: 1, 256>}, {transform_indices = @transform_5, window_bounds = array<i64: 8, 256>}]} {
    %c0 = arith.constant 0 : index
    %c0_0 = arith.constant 0 : index
    %0 = vector.load %arg1[%c0, %c0_0] : memref<8x256xf32, #tpu.memory_space<vmem>>, vector<8x256xf32>
    %1 = arith.truncf %0 : vector<8x256xf32> to vector<8x256xbf16>
    %c0_1 = arith.constant 0 : index
    %c0_2 = arith.constant 0 : index
    %2 = vector.load %arg2[%c0_1, %c0_2] : memref<256x512xbf16, #tpu.memory_space<vmem>>, vector<256x512xbf16>
    %cst = arith.constant dense<0.000000e+00> : vector<8x512xf32>
    %3 = tpu.matmul %1, %2, %cst {dimension_numbers = #tpu.dot_dimension_numbers<[1], [0], [0], [1], [0, 0, 1, 1], [], []>} : vector<8x256xbf16>, vector<256x512xbf16>, vector<8x512xf32> -> vector<8x512xf32>
    %c0_3 = arith.constant 0 : index
    %c0_4 = arith.constant 0 : index
    %4 = vector.load %arg3[%c0_3, %c0_4] : memref<1x512xf32, #tpu.memory_space<vmem>>, vector<1x512xf32>
    %5 = vector.broadcast %4 : vector<1x512xf32> to vector<8x512xf32>
    %6 = arith.addf %3, %5 : vector<8x512xf32>
    %cst_5 = arith.constant 0.000000e+00 : f32
    %7 = vector.broadcast %cst_5 : f32 to vector<8x512xf32>
    %8 = arith.cmpf oge, %6, %7 : vector<8x512xf32>
    %cst_6 = arith.constant 0.00999999977 : f32
    %9 = vector.broadcast %cst_6 : f32 to vector<8x512xf32>
    %10 = arith.mulf %9, %6 : vector<8x512xf32>
    %11 = arith.select %8, %6, %10 : vector<8x512xi1>, vector<8x512xf32>
    %12 = arith.truncf %11 : vector<8x512xf32> to vector<8x512xbf16>
    %c0_7 = arith.constant 0 : index
    %c0_8 = arith.constant 0 : index
    %13 = vector.load %arg4[%c0_7, %c0_8] : memref<512x256xbf16, #tpu.memory_space<vmem>>, vector<512x256xbf16>
    %cst_9 = arith.constant dense<0.000000e+00> : vector<8x256xf32>
    %14 = tpu.matmul %12, %13, %cst_9 {dimension_numbers = #tpu.dot_dimension_numbers<[1], [0], [0], [1], [0, 0, 1, 1], [], []>} : vector<8x512xbf16>, vector<512x256xbf16>, vector<8x256xf32> -> vector<8x256xf32>
    %c0_10 = arith.constant 0 : index
    %c0_11 = arith.constant 0 : index
    %15 = vector.load %arg5[%c0_10, %c0_11] : memref<1x256xf32, #tpu.memory_space<vmem>>, vector<1x256xf32>
    %16 = vector.broadcast %15 : vector<1x256xf32> to vector<8x256xf32>
    %17 = arith.addf %14, %16 : vector<8x256xf32>
    %cst_12 = arith.constant 0.000000e+00 : f32
    %18 = vector.broadcast %cst_12 : f32 to vector<8x256xf32>
    %19 = arith.cmpf oge, %17, %18 : vector<8x256xf32>
    %cst_13 = arith.constant 0.00999999977 : f32
    %20 = vector.broadcast %cst_13 : f32 to vector<8x256xf32>
    %21 = arith.mulf %20, %17 : vector<8x256xf32>
    %22 = arith.select %19, %17, %21 : vector<8x256xi1>, vector<8x256xf32>
    %c0_14 = arith.constant 0 : index
    %c0_15 = arith.constant 0 : index
    %23 = vector.load %arg6[%c0_14, %c0_15] : memref<8x256xf32, #tpu.memory_space<vmem>>, vector<8x256xf32>
    tpu.vector_store %arg6[%c0_14, %c0_15], %22 {strides = array<i32>} : memref<8x256xf32, #tpu.memory_space<vmem>>, vector<8x256xf32>,
    return
  }
  func.func @transform_0(%arg0: i32) -> (i32, i32) {
    %c0_i32 = arith.constant 0 : i32
    %c0_i32_0 = arith.constant 0 : i32
    return %arg0, %c0_i32 : i32, i32
  }
  func.func @transform_1(%arg0: i32) -> (i32, i32) {
    %c0_i32 = arith.constant 0 : i32
    %c0_i32_0 = arith.constant 0 : i32
    %c0_i32_1 = arith.constant 0 : i32
    return %c0_i32, %c0_i32_0 : i32, i32
  }
  func.func @transform_2(%arg0: i32) -> (i32, i32) {
    %c0_i32 = arith.constant 0 : i32
    %c0_i32_0 = arith.constant 0 : i32
    %c0_i32_1 = arith.constant 0 : i32
    return %c0_i32, %c0_i32_0 : i32, i32
  }
  func.func @transform_3(%arg0: i32) -> (i32, i32) {
    %c0_i32 = arith.constant 0 : i32
    %c0_i32_0 = arith.constant 0 : i32
    %c0_i32_1 = arith.constant 0 : i32
    return %c0_i32, %c0_i32_0 : i32, i32
  }
  func.func @transform_4(%arg0: i32) -> (i32, i32) {
    %c0_i32 = arith.constant 0 : i32
    %c0_i32_0 = arith.constant 0 : i32
    %c0_i32_1 = arith.constant 0 : i32
    return %c0_i32, %c0_i32_0 : i32, i32
  }
  func.func @transform_5(%arg0: i32) -> (i32, i32) {
    %c0_i32 = arith.constant 0 : i32
    %c0_i32_0 = arith.constant 0 : i32
    return %arg0, %c0_i32 : i32, i32
  }
}

module attributes {stable_mosaic.version = 11 : i64} {
  func.func @lattice_net_kernel(%arg0: i32, %arg1: memref<8x256xf32, #tpu.memory_space<vmem>>, %arg2: memref<256x512xbf16, #tpu.memory_space<vmem>>, %arg3: memref<1x512xf32, #tpu.memory_space<vmem>>, %arg4: memref<512x256xbf16, #tpu.memory_space<vmem>>, %arg5: memref<1x256xf32, #tpu.memory_space<vmem>>, %arg6: memref<8x256xf32, #tpu.memory_space<vmem>>) attributes {dimension_semantics = [#tpu.dimension_semantics<parallel>], iteration_bounds = array<i64: 1>, scalar_prefetch = 0 : i64, scratch_operands = 0 : i64, tpu.core_type = #tpu.core_type<tc>, window_params = [{transform_indices = @transform_0, window_bounds = array<i64: 8, 256>}, {pipeline_mode = #tpu.pipeline_mode<synchronous>, transform_indices = @transform_1, window_bounds = array<i64: 256, 512>}, {pipeline_mode = #tpu.pipeline_mode<synchronous>, transform_indices = @transform_2, window_bounds = array<i64: 1, 512>}, {pipeline_mode = #tpu.pipeline_mode<synchronous>, transform_indices = @transform_3, window_bounds = array<i64: 512, 256>}, {pipeline_mode = #tpu.pipeline_mode<synchronous>, transform_indices = @transform_4, window_bounds = array<i64: 1, 256>}, {transform_indices = @transform_5, window_bounds = array<i64: 8, 256>}]} {
    %c0 = arith.constant 0 : index
    %c0_0 = arith.constant 0 : index
    %0 = vector.load %arg1[%c0, %c0_0] : memref<8x256xf32, #tpu.memory_space<vmem>>, vector<8x256xf32>
    %1 = arith.truncf %0 : vector<8x256xf32> to vector<8x256xbf16>
    %c0_1 = arith.constant 0 : index
    %c0_2 = arith.constant 0 : index
    %2 = vector.load %arg2[%c0_1, %c0_2] : memref<256x512xbf16, #tpu.memory_space<vmem>>, vector<256x512xbf16>
    %cst = arith.constant dense<0.000000e+00> : vector<8x512xf32>
    %3 = tpu.matmul %1, %2, %cst {dimension_numbers = #tpu.dot_dimension_numbers<[1], [0], [0], [1], [0, 0, 1, 1], [], []>} : vector<8x256xbf16>, vector<256x512xbf16>, vector<8x512xf32> -> vector<8x512xf32>
    %c0_3 = arith.constant 0 : index
    %c0_4 = arith.constant 0 : index
    %4 = vector.load %arg3[%c0_3, %c0_4] : memref<1x512xf32, #tpu.memory_space<vmem>>, vector<1x512xf32>
    %5 = vector.broadcast %4 : vector<1x512xf32> to vector<8x512xf32>
    %6 = arith.addf %3, %5 : vector<8x512xf32>
    %cst_5 = arith.constant 0.000000e+00 : f32
    %7 = vector.broadcast %cst_5 : f32 to vector<8x512xf32>
    %8 = arith.cmpf oge, %6, %7 : vector<8x512xf32>
    %cst_6 = arith.constant 0.00999999977 : f32
    %9 = vector.broadcast %cst_6 : f32 to vector<8x512xf32>
    %10 = arith.mulf %9, %6 : vector<8x512xf32>
    %11 = arith.select %8, %6, %10 : vector<8x512xi1>, vector<8x512xf32>
    %12 = arith.truncf %11 : vector<8x512xf32> to vector<8x512xbf16>
    %c0_7 = arith.constant 0 : index
    %c0_8 = arith.constant 0 : index
    %13 = vector.load %arg4[%c0_7, %c0_8] : memref<512x256xbf16, #tpu.memory_space<vmem>>, vector<512x256xbf16>
    %cst_9 = arith.constant dense<0.000000e+00> : vector<8x256xf32>
    %14 = tpu.matmul %12, %13, %cst_9 {dimension_numbers = #tpu.dot_dimension_numbers<[1], [0], [0], [1], [0, 0, 1, 1], [], []>} : vector<8x512xbf16>, vector<512x256xbf16>, vector<8x256xf32> -> vector<8x256xf32>
    %c0_10 = arith.constant 0 : index
    %c0_11 = arith.constant 0 : index
    %15 = vector.load %arg5[%c0_10, %c0_11] : memref<1x256xf32, #tpu.memory_space<vmem>>, vector<1x256xf32>
    %16 = vector.broadcast %15 : vector<1x256xf32> to vector<8x256xf32>
    %17 = arith.addf %14, %16 : vector<8x256xf32>
    %cst_12 = arith.constant 0.000000e+00 : f32
    %18 = vector.broadcast %cst_12 : f32 to vector<8x256xf32>
    %19 = arith.cmpf oge, %17, %18 : vector<8x256xf32>
    %cst_13 = arith.constant 0.00999999977 : f32
    %20 = vector.broadcast %cst_13 : f32 to vector<8x256xf32>
    %21 = arith.mulf %20, %17 : vector<8x256xf32>
    %22 = arith.select %19, %17, %21 : vector<8x256xi1>, vector<8x256xf32>
    %c0_14 = arith.constant 0 : index
    %c0_15 = arith.constant 0 : index
    %23 = vector.load %arg6[%c0_14, %c0_15] : memref<8x256xf32, #tpu.memory_space<vmem>>, vector<8x256xf32>
    tpu.vector_store %arg6[%c0_14, %c0_15], %22 {strides = array<i32>} : memref<8x256xf32, #tpu.memory_space<vmem>>, vector<8x256xf32>,
    return
  }
  func.func @transform_0(%arg0: i32) -> (i32, i32) {
    %c0_i32 = arith.constant 0 : i32
    %c0_i32_0 = arith.constant 0 : i32
    return %arg0, %c0_i32 : i32, i32
  }
  func.func @transform_1(%arg0: i32) -> (i32, i32) {
    %c0_i32 = arith.constant 0 : i32
    %c0_i32_0 = arith.constant 0 : i32
    %c0_i32_1 = arith.constant 0 : i32
    return %c0_i32, %c0_i32_0 : i32, i32
  }
  func.func @transform_2(%arg0: i32) -> (i32, i32) {
    %c0_i32 = arith.constant 0 : i32
    %c0_i32_0 = arith.constant 0 : i32
    %c0_i32_1 = arith.constant 0 : i32
    return %c0_i32, %c0_i32_0 : i32, i32
  }
  func.func @transform_3(%arg0: i32) -> (i32, i32) {
    %c0_i32 = arith.constant 0 : i32
    %c0_i32_0 = arith.constant 0 : i32
    %c0_i32_1 = arith.constant 0 : i32
    return %c0_i32, %c0_i32_0 : i32, i32
  }
  func.func @transform_4(%arg0: i32) -> (i32, i32) {
    %c0_i32 = arith.constant 0 : i32
    %c0_i32_0 = arith.constant 0 : i32
    %c0_i32_1 = arith.constant 0 : i32
    return %c0_i32, %c0_i32_0 : i32, i32
  }
  func.func @transform_5(%arg0: i32) -> (i32, i32) {
    %c0_i32 = arith.constant 0 : i32
    %c0_i32_0 = arith.constant 0 : i32
    return %arg0, %c0_i32 : i32, i32
  }
}

</mosaic_0001>

<bundles_post_ra>
// kernel: tpu_custom_call.1
= control target key start
LH: loop header
LB: loop body
LE: loop exit
PB: predicated region body
PF: predicated region fallthrough
CT: control target
= control target key end

     0   :  { %10 = vsyncpa [#allocation3], 0  ;;  %s1577_s0 = inlined_call_operand.hbm [shape: f32[8,256], index: 0, kind: input, shape index: {}]   ;;  %s1578_s1 = inlined_call_operand.hbm [shape: bf16[256,512], index: 1, kind: input, shape index: {}]   ;;  %s1579_s2 = inlined_call_operand.hbm [shape: f32[1,512], index: 2, kind: input, shape index: {}]   ;;  %s1580_s3 = inlined_call_operand.hbm [shape: bf16[512,256], index: 3, kind: input, shape index: {}]   ;;  %s1581_s4 = inlined_call_operand.vmem [shape: f32[1,256], index: 4, kind: input, shape index: {}]   ;;  %s1582_s5 = inlined_call_operand.hbm [shape: f32[8,256], index: 5, kind: output, shape index: {}]  }
   0x1   :  { %11 = vsyncpa [#allocation6], 0 }
   0x2   :  { %12 = vsyncpa [#allocation9], 0 }
   0x3   :  { %13 = vsyncpa [#allocation4], 0  ;;  %s1520_s18 = smov [#allocation5]  }
   0x4   :  { %s29_s19 = sshll.u32 %s1520_s18, 4  ;;  %s30_s19 = int_to_ptr.vmem [resolvable:$true] %s29_s19 }
   0x5   :  { %s1420_s20 = scalar_lea.vmem %s30_s19, 8192  ;;  %p1425_p1 = scmp.lt.s32.totalorder %s30_s19, %s30_s19 }
   0x6   :  { %p1421_p0 = scmp.ne.s32.totalorder %s30_s19, %s1420_s20  ;;  %p1426_p2 = scmp.lt.s32.totalorder %s1420_s20, %s1420_s20 }
   0x8   :  { %p1427_p3 = por %p1426_p2, %p1425_p1 }
   0xa   :  { %p1428_p4 = pnand %p1427_p3, %p1421_p0 }
   0xc   :  { %1431 = shalt.err (!%p1428_p4)
}
   0xd   :  { %s1521_s21 = smov 256   ;;  %s1522_s22 = smov 16  }
   0xe   :  { %35 = dma.hbm_to_vmem [thread:$0]  %s1578_s1, 8192, %s30_s19, [#allocation6], %s1521_s21, %s1521_s21, %s1522_s22  }
   0xf   :  { %s1523_s25 = smov [#allocation2]   ;;  %s1524_s27 = smov [#allocation7]  }
  0x10   :  { %s20_s26 = sshll.u32 %s1523_s25, 4  ;;  %s42_s28 = sshll.u32 %s1524_s27, 4  ;;  %s21_s26 = int_to_ptr.vmem [resolvable:$true] %s20_s26  ;;  %s43_s28 = int_to_ptr.vmem [resolvable:$true] %s42_s28 }
  0x11   :  { %s1440_s29 = scalar_lea.vmem %s21_s26, 256  ;;  %p1445_p6 = scmp.lt.s32.totalorder %s21_s26, %s21_s26 }
  0x12   :  { %p1441_p5 = scmp.ne.s32.totalorder %s21_s26, %s1440_s29  ;;  %p1446_p7 = scmp.lt.s32.totalorder %s1440_s29, %s1440_s29 }
  0x14   :  { %p1447_p8 = por %p1446_p7, %p1445_p6 }
  0x16   :  { %p1448_p9 = pnand %p1447_p8, %p1441_p5 }
  0x18   :  { %1451 = shalt.err (!%p1448_p9)
}
  0x19   :  { %23 = dma.hbm_to_vmem [thread:$0]  %s1577_s0, 256, %s21_s26, [#allocation3]  }
  0x1a   :  { %s1460_s7 = scalar_lea.vmem %s43_s28, 64  ;;  %p1465_p11 = scmp.lt.s32.totalorder %s43_s28, %s43_s28 }
  0x1b   :  { %p1461_p10 = scmp.ne.s32.totalorder %s43_s28, %s1460_s7  ;;  %p1466_p12 = scmp.lt.s32.totalorder %s1460_s7, %s1460_s7 }
  0x1d   :  { %p1467_p13 = por %p1466_p12, %p1465_p11 }
  0x1f   :  { %p1468_p0 = pnand %p1467_p13, %p1461_p10 }
  0x21   :  { %1471 = shalt.err (!%p1468_p0)
}
  0x22   :  { %45 = dma.hbm_to_vmem [thread:$0]  %s1579_s2, 64, %s43_s28, [#allocation6]  }
  0x23   :  { %s1525_s9 = smov [#allocation8]  }
  0x24   :  { %s51_s10 = sshll.u32 %s1525_s9, 4  ;;  %s52_s10 = int_to_ptr.vmem [resolvable:$true] %s51_s10 }
  0x25   :  { %s1480_s11 = scalar_lea.vmem %s52_s10, 8192  ;;  %p1485_p2 = scmp.lt.s32.totalorder %s52_s10, %s52_s10 }
  0x26   :  { %p1481_p1 = scmp.ne.s32.totalorder %s52_s10, %s1480_s11  ;;  %p1486_p3 = scmp.lt.s32.totalorder %s1480_s11, %s1480_s11 }
  0x28   :  { %p1487_p4 = por %p1486_p3, %p1485_p2 }
  0x2a   :  { %p1488_p5 = pnand %p1487_p4, %p1481_p1 }
  0x2c   :  { %1491 = shalt.err (!%p1488_p5)
}
  0x2d   :  { %s1526_s0 = smov 128   ;;  %s1527_s12 = smov 8  }
  0x2e   :  { %57 = dma.hbm_to_vmem [thread:$0]  %s1580_s3, 8192, %s52_s10, [#allocation9], %s1526_s0, %s1526_s0, %s1527_s12  }
  0x2f   :  { %1512 = dma.done.wait [#allocation3], 256  }
  0x30   :  { %1513 = vsyncadd [#allocation3], 4294967040 }
  0x31   :  { %1514 = dma.done.wait [#allocation6], 8256  }
  0x32   :  { %1515 = vsyncadd [#allocation6], 4294959040 }
  0x33   :  { %1516 = dma.done.wait [#allocation9], 8192  }
  0x34   :  { %1517 = vsyncadd [#allocation9], 4294959104  ;;  %v1220_v0 = vld [vmem:[#allocation5 + $0xe4] ss:$16 sps:$4 sm:$0xff]   ;;  %v1222_v1 = vld [vmem:[#allocation5 + $0xec] ss:$16 sps:$4 sm:$0xff]  }
  0x35   :  { %482 = vmatprep.subr.bf16.mxu0 %v1220_v0  ;;  %v1224_v2 = vld [vmem:[#allocation5 + $0xe0] ss:$16 sps:$4 sm:$0xff]   ;;  %v1225_v3 = vld [vmem:[#allocation5 + $0xe8] ss:$16 sps:$4 sm:$0xff]   ;;  %523 = vmatprep.subr.bf16.mxu1 %v1222_v1  ;;  %v1226_v4 = vld [vmem:[#allocation5 + $0xc4] ss:$16 sps:$4 sm:$0xff]  }
  0x36   :  { %483 = vmatpush1.bf16.msra.mxu0 %v1224_v2  ;;  %524 = vmatpush1.bf16.msra.mxu1 %v1225_v3  ;;  %v1228_v5 = vld [vmem:[#allocation5 + $0xcc] ss:$16 sps:$4 sm:$0xff]   ;;  %v1230_v6 = vld [vmem:[#allocation5 + $0xc0] ss:$16 sps:$4 sm:$0xff]   ;;  %v1231_v7 = vld [vmem:[#allocation5 + $0xc8] ss:$16 sps:$4 sm:$0xff]  }
  0x37   :  { %484 = vmatprep.subr.bf16.mxu0 %v1226_v4  ;;  %525 = vmatprep.subr.bf16.mxu1 %v1228_v5  ;;  %v1232_v8 = vld [vmem:[#allocation5 + $0xa4] ss:$16 sps:$4 sm:$0xff]   ;;  %v1234_v9 = vld [vmem:[#allocation5 + $0xac] ss:$16 sps:$4 sm:$0xff]   ;;  %v1236_v10 = vld [vmem:[#allocation5 + $0xa0] ss:$16 sps:$4 sm:$0xff]  }
  0x38   :  { %v1237_v11 = vld [vmem:[#allocation5 + $0xa8] ss:$16 sps:$4 sm:$0xff]   ;;  %v1238_v12 = vld [vmem:[#allocation5 + $0x84] ss:$16 sps:$4 sm:$0xff]   ;;  %v1240_v13 = vld [vmem:[#allocation5 + $0x8c] ss:$16 sps:$4 sm:$0xff]  }
  0x39   :  { %v1242_v14 = vld [vmem:[#allocation5 + $0x80] ss:$16 sps:$4 sm:$0xff]   ;;  %v1243_v15 = vld [vmem:[#allocation5 + $0x88] ss:$16 sps:$4 sm:$0xff]   ;;  %v1244_v16 = vld [vmem:[#allocation5 + $0x64] ss:$16 sps:$4 sm:$0xff]  }
  0x3a   :  { %485 = vmatpush1.bf16.msra.mxu0 %v1230_v6  ;;  %526 = vmatpush1.bf16.msra.mxu1 %v1231_v7  ;;  %v1246_v17 = vld [vmem:[#allocation5 + $0x6c] ss:$16 sps:$4 sm:$0xff]   ;;  %v1248_v18 = vld [vmem:[#allocation5 + $0x60] ss:$16 sps:$4 sm:$0xff]   ;;  %v1249_v19 = vld [vmem:[#allocation5 + $0x68] ss:$16 sps:$4 sm:$0xff]  }
  0x3b   :  { %486 = vmatprep.subr.bf16.mxu0 %v1232_v8  ;;  %527 = vmatprep.subr.bf16.mxu1 %v1234_v9  ;;  %v1250_v20 = vld [vmem:[#allocation5 + $0x44] ss:$16 sps:$4 sm:$0xff]   ;;  %v1252_v21 = vld [vmem:[#allocation5 + $0x4c] ss:$16 sps:$4 sm:$0xff]   ;;  %v1254_v22 = vld [vmem:[#allocation5 + $0x40] ss:$16 sps:$4 sm:$0xff]  }
  0x3c   :  { %v1255_v23 = vld [vmem:[#allocation5 + $0x48] ss:$16 sps:$4 sm:$0xff]   ;;  %v1256_v24 = vld [vmem:[#allocation5 + $0x24] ss:$16 sps:$4 sm:$0xff]   ;;  %v1258_v25 = vld [vmem:[#allocation5 + $0x2c] ss:$16 sps:$4 sm:$0xff]  }
  0x3d   :  { %v1260_v26 = vld [vmem:[#allocation5 + $0x20] ss:$16 sps:$4 sm:$0xff]   ;;  %v1261_v27 = vld [vmem:[#allocation5 + $0x28] ss:$16 sps:$4 sm:$0xff]   ;;  %v1262_v28 = vld [vmem:[#allocation5 + $0x4] ss:$16 sps:$4 sm:$0xff]  }
  0x3e   :  { %487 = vmatpush1.bf16.msra.mxu0 %v1236_v10  ;;  %528 = vmatpush1.bf16.msra.mxu1 %v1237_v11  ;;  %v1264_v29 = vld [vmem:[#allocation5 + $0xc] ss:$16 sps:$4 sm:$0xff]   ;;  %v1266_v30 = vld [vmem:[#allocation5] ss:$16 sps:$4 sm:$0xff]   ;;  %v1267_v31 = vld [vmem:[#allocation5 + $0x8] ss:$16 sps:$4 sm:$0xff]  }
  0x3f   :  { %488 = vmatprep.subr.bf16.mxu0 %v1238_v12  ;;  %529 = vmatprep.subr.bf16.mxu1 %v1240_v13  ;;  %v1268_v32 = vld [vmem:[#allocation5 + $0x1e4] ss:$16 sps:$4 sm:$0xff]   ;;  %v1270_v33 = vld [vmem:[#allocation5 + $0x1ec] ss:$16 sps:$4 sm:$0xff]   ;;  %v1272_v34 = vld [vmem:[#allocation5 + $0x1e0] ss:$16 sps:$4 sm:$0xff]  }
  0x40   :  { %v1273_v35 = vld [vmem:[#allocation5 + $0x1e8] ss:$16 sps:$4 sm:$0xff]   ;;  %v1274_v36 = vld [vmem:[#allocation5 + $0x1c4] ss:$16 sps:$4 sm:$0xff]   ;;  %v1276_v37 = vld [vmem:[#allocation5 + $0x1cc] ss:$16 sps:$4 sm:$0xff]  }
  0x41   :  { %v1278_v38 = vld [vmem:[#allocation5 + $0x1c0] ss:$16 sps:$4 sm:$0xff]   ;;  %v1279_v39 = vld [vmem:[#allocation5 + $0x1c8] ss:$16 sps:$4 sm:$0xff]   ;;  %v1280_v40 = vld [vmem:[#allocation5 + $0x1a4] ss:$16 sps:$4 sm:$0xff]  }
  0x42   :  { %489 = vmatpush1.bf16.msra.mxu0 %v1242_v14  ;;  %530 = vmatpush1.bf16.msra.mxu1 %v1243_v15  ;;  %v1282_v41 = vld [vmem:[#allocation5 + $0x1ac] ss:$16 sps:$4 sm:$0xff]   ;;  %v1284_v42 = vld [vmem:[#allocation5 + $0x1a0] ss:$16 sps:$4 sm:$0xff]   ;;  %v1285_v43 = vld [vmem:[#allocation5 + $0x1a8] ss:$16 sps:$4 sm:$0xff]  }
  0x43   :  { %490 = vmatprep.subr.bf16.mxu0 %v1244_v16  ;;  %531 = vmatprep.subr.bf16.mxu1 %v1246_v17  ;;  %v1286_v44 = vld [vmem:[#allocation5 + $0x184] ss:$16 sps:$4 sm:$0xff]   ;;  %v1288_v45 = vld [vmem:[#allocation5 + $0x18c] ss:$16 sps:$4 sm:$0xff]   ;;  %v1290_v48 = vld [vmem:[#allocation5 + $0x180] ss:$16 sps:$4 sm:$0xff]  }
  0x44   :  { %v73_v46 = vld [vmem:[#allocation2 + $0x8] sm:$0xff]  ;;  %v1292_v50 = vld [vmem:[#allocation5 + $0x164] ss:$16 sps:$4 sm:$0xff]   ;;  %v1296_v52 = vld [vmem:[#allocation5 + $0x160] ss:$16 sps:$4 sm:$0xff]   ;;  %s1528_s15 = smov [#allocation10]  }
  0x45   :  { %v75_v47 = vpack.c.bf16 %v73_v46, %v73_v46  ;;  %v1291_v49 = vld [vmem:[#allocation5 + $0x188] ss:$16 sps:$4 sm:$0xff]   ;;  %v1294_v51 = vld [vmem:[#allocation5 + $0x16c] ss:$16 sps:$4 sm:$0xff]   ;;  %v1298_v54 = vld [vmem:[#allocation5 + $0x144] ss:$16 sps:$4 sm:$0xff]  }
  0x46   :  { %491 = vmatpush1.bf16.msra.mxu0 %v1248_v18  ;;  %532 = vmatpush1.bf16.msra.mxu1 %v1249_v19  ;;  %v1297_v53 = vld [vmem:[#allocation5 + $0x168] ss:$16 sps:$4 sm:$0xff]   ;;  %v1300_v55 = vld [vmem:[#allocation5 + $0x14c] ss:$16 sps:$4 sm:$0xff]   ;;  %v1302_v56 = vld [vmem:[#allocation5 + $0x140] ss:$16 sps:$4 sm:$0xff]  }
  0x47   :  { %492 = vmatprep.subr.bf16.mxu0 %v1250_v20  ;;  %533 = vmatprep.subr.bf16.mxu1 %v1252_v21  ;;  %v1303_v57 = vld [vmem:[#allocation5 + $0x148] ss:$16 sps:$4 sm:$0xff]   ;;  %v1304_v58 = vld [vmem:[#allocation5 + $0x124] ss:$16 sps:$4 sm:$0xff]   ;;  %v1306_v59 = vld [vmem:[#allocation5 + $0x12c] ss:$16 sps:$4 sm:$0xff]  }
  0x48   :  { %514 = vmatprep.mubr.bf16.mxu0 %v75_v47  ;;  %555 = vmatprep.mubr.bf16.mxu1 %v75_v47  ;;  %v1308_v60 = vld [vmem:[#allocation5 + $0x120] ss:$16 sps:$4 sm:$0xff]   ;;  %v1309_v61 = vld [vmem:[#allocation5 + $0x128] ss:$16 sps:$4 sm:$0xff]   ;;  %v1310_v62 = vld [vmem:[#allocation5 + $0x104] ss:$16 sps:$4 sm:$0xff]  }
  0x49   :  { %v1312_v63 = vld [vmem:[#allocation5 + $0x10c] ss:$16 sps:$4 sm:$0xff]   ;;  %v1314_v0 = vld [vmem:[#allocation5 + $0x100] ss:$16 sps:$4 sm:$0xff]   ;;  %v1315_v1 = vld [vmem:[#allocation5 + $0x108] ss:$16 sps:$4 sm:$0xff]  }
  0x4a   :  { %493 = vmatpush1.bf16.msra.mxu0 %v1254_v22  ;;  %534 = vmatpush1.bf16.msra.mxu1 %v1255_v23  ;;  %v72_v2 = vld [vmem:[#allocation2] sm:$0xff]  ;;  %v1318_v3 = vld [vmem:[#allocation8 + $0x74] ss:$8 sps:$4 sm:$0xff]   ;;  %v1322_v10 = vld [vmem:[#allocation8 + $0x60] ss:$8 sps:$4 sm:$0xff]   ;;  %s1072_s16 = sshll.u32 %s1528_s15, 4  ;;  %s1073_s16 = int_to_ptr.vmem [resolvable:$true] %s1072_s16 }
  0x4b   :  { %494 = vmatprep.subr.bf16.mxu0 %v1256_v24  ;;  %535 = vmatprep.subr.bf16.mxu1 %v1258_v25  ;;  %v1321_v4 = vld [vmem:[#allocation8 + $0x174] ss:$8 sps:$4 sm:$0xff]   ;;  %v74_v5 = vpack.c.bf16 %v72_v2, %v72_v2  ;;  %v1316_v6 = vld [vmem:[#allocation8 + $0x70] ss:$8 sps:$4 sm:$0xff]   ;;  %v1324_v8 = vld [vmem:[#allocation8 + $0x64] ss:$8 sps:$4 sm:$0xff]   ;;  %p1497_p7 = scmp.lt.s32.totalorder %s1073_s16, %s1073_s16 }
  0x4c   :  { %v1319_v7 = vld [vmem:[#allocation8 + $0x170] ss:$8 sps:$4 sm:$0xff]   ;;  %v1327_v9 = vld [vmem:[#allocation8 + $0x164] ss:$8 sps:$4 sm:$0xff]   ;;  %v1325_v11 = vld [vmem:[#allocation8 + $0x160] ss:$8 sps:$4 sm:$0xff]  }
  0x4d   :  { %v1330_v12 = vld [vmem:[#allocation8 + $0x54] ss:$8 sps:$4 sm:$0xff]   ;;  %v1328_v14 = vld [vmem:[#allocation8 + $0x50] ss:$8 sps:$4 sm:$0xff]   ;;  %v1336_v16 = vld [vmem:[#allocation8 + $0x44] ss:$8 sps:$4 sm:$0xff]  }
  0x4e   :  { %495 = vmatpush1.bf16.msra.mxu0 %v1260_v26  ;;  %536 = vmatpush1.bf16.msra.mxu1 %v1261_v27  ;;  %v1333_v13 = vld [vmem:[#allocation8 + $0x154] ss:$8 sps:$4 sm:$0xff]   ;;  %v1331_v15 = vld [vmem:[#allocation8 + $0x150] ss:$8 sps:$4 sm:$0xff]   ;;  %v1339_v17 = vld [vmem:[#allocation8 + $0x144] ss:$8 sps:$4 sm:$0xff]  }
  0x4f   :  { %496 = vmatprep.subr.bf16.mxu0 %v1262_v28  ;;  %537 = vmatprep.subr.bf16.mxu1 %v1264_v29  ;;  %v1334_v18 = vld [vmem:[#allocation8 + $0x40] ss:$8 sps:$4 sm:$0xff]   ;;  %v1342_v20 = vld [vmem:[#allocation8 + $0x34] ss:$8 sps:$4 sm:$0xff]   ;;  %v1340_v22 = vld [vmem:[#allocation8 + $0x30] ss:$8 sps:$4 sm:$0xff]  }
  0x50   :  { %v1337_v19 = vld [vmem:[#allocation8 + $0x140] ss:$8 sps:$4 sm:$0xff]   ;;  %v1345_v21 = vld [vmem:[#allocation8 + $0x134] ss:$8 sps:$4 sm:$0xff]   ;;  %v1343_v23 = vld [vmem:[#allocation8 + $0x130] ss:$8 sps:$4 sm:$0xff]  }
  0x51   :  { %v1348_v24 = vld [vmem:[#allocation8 + $0x24] ss:$8 sps:$4 sm:$0xff]   ;;  %v1346_v26 = vld [vmem:[#allocation8 + $0x20] ss:$8 sps:$4 sm:$0xff]   ;;  %v1354_v28 = vld [vmem:[#allocation8 + $0x14] ss:$8 sps:$4 sm:$0xff]  }
  0x52   :  { %497 = vmatpush1.bf16.msra.mxu0 %v1266_v30  ;;  %538 = vmatpush1.bf16.msra.mxu1 %v1267_v31  ;;  %v1351_v25 = vld [vmem:[#allocation8 + $0x124] ss:$8 sps:$4 sm:$0xff]   ;;  %v1349_v27 = vld [vmem:[#allocation8 + $0x120] ss:$8 sps:$4 sm:$0xff]   ;;  %v1357_v29 = vld [vmem:[#allocation8 + $0x114] ss:$8 sps:$4 sm:$0xff]  }
  0x53   :  { %498 = vmatprep.subr.bf16.mxu0 %v1268_v32  ;;  %539 = vmatprep.subr.bf16.mxu1 %v1270_v33  ;;  %v1352_v30 = vld [vmem:[#allocation8 + $0x10] ss:$8 sps:$4 sm:$0xff]   ;;  %v1360_v32 = vld [vmem:[#allocation8 + $0x4] ss:$8 sps:$4 sm:$0xff]   ;;  %v1409_v2 = vld [vmem:[#allocation8 + $0x180] ss:$8 sps:$4 sm:$0xff]  }
  0x54   :  { %v1355_v31 = vld [vmem:[#allocation8 + $0x110] ss:$8 sps:$4 sm:$0xff]   ;;  %v1363_v33 = vld [vmem:[#allocation8 + $0x104] ss:$8 sps:$4 sm:$0xff]  }
  0x55   :  { %v1376_v46 = vld [vmem:[#allocation8 + $0xd0] ss:$8 sps:$4 sm:$0xff]  }
  0x56   :  { %499 = vmatpush2.bf16.msra.mxu0 %v1272_v34  ;;  %540 = vmatpush2.bf16.msra.mxu1 %v1273_v35  ;;  %v1358_v34 = vld [vmem:[#allocation8] ss:$8 sps:$4 sm:$0xff]   ;;  %v1379_v47 = vld [vmem:[#allocation8 + $0x1d0] ss:$8 sps:$4 sm:$0xff]  }
  0x57   :  { %500 = vmatprep.subr.bf16.mxu0 %v1274_v36  ;;  %541 = vmatprep.subr.bf16.mxu1 %v1276_v37  ;;  %v1361_v35 = vld [vmem:[#allocation8 + $0x100] ss:$8 sps:$4 sm:$0xff]   ;;  %v1366_v36 = vld [vmem:[#allocation8 + $0xf4] ss:$8 sps:$4 sm:$0xff]  }
  0x58   :  { %v1369_v37 = vld [vmem:[#allocation8 + $0x1f4] ss:$8 sps:$4 sm:$0xff]  }
  0x5a   :  { %501 = vmatpush2.bf16.msra.mxu0 %v1278_v38  ;;  %542 = vmatpush2.bf16.msra.mxu1 %v1279_v39  ;;  %v1364_v38 = vld [vmem:[#allocation8 + $0xf0] ss:$8 sps:$4 sm:$0xff]  }
  0x5b   :  { %502 = vmatprep.subr.bf16.mxu0 %v1280_v40  ;;  %543 = vmatprep.subr.bf16.mxu1 %v1282_v41  ;;  %v1367_v39 = vld [vmem:[#allocation8 + $0x1f0] ss:$8 sps:$4 sm:$0xff]   ;;  %v1372_v40 = vld [vmem:[#allocation8 + $0xe4] ss:$8 sps:$4 sm:$0xff]  }
  0x5c   :  { %v1375_v41 = vld [vmem:[#allocation8 + $0x1e4] ss:$8 sps:$4 sm:$0xff]  }
  0x5e   :  { %503 = vmatpush2.bf16.msra.mxu0 %v1284_v42  ;;  %544 = vmatpush2.bf16.msra.mxu1 %v1285_v43  ;;  %v1370_v42 = vld [vmem:[#allocation8 + $0xe0] ss:$8 sps:$4 sm:$0xff]  }
  0x5f   :  { %504 = vmatprep.subr.bf16.mxu0 %v1286_v44  ;;  %545 = vmatprep.subr.bf16.mxu1 %v1288_v45  ;;  %v1373_v43 = vld [vmem:[#allocation8 + $0x1e0] ss:$8 sps:$4 sm:$0xff]   ;;  %v1378_v44 = vld [vmem:[#allocation8 + $0xd4] ss:$8 sps:$4 sm:$0xff]  }
  0x60   :  { %v1381_v45 = vld [vmem:[#allocation8 + $0x1d4] ss:$8 sps:$4 sm:$0xff]  }
  0x62   :  { %505 = vmatpush2.bf16.msra.mxu0 %v1290_v48  ;;  %546 = vmatpush2.bf16.msra.mxu1 %v1291_v49  ;;  %v1384_v48 = vld [vmem:[#allocation8 + $0xc4] ss:$8 sps:$4 sm:$0xff]  }
  0x63   :  { %506 = vmatprep.subr.bf16.mxu0 %v1292_v50  ;;  %547 = vmatprep.subr.bf16.mxu1 %v1294_v51  ;;  %v1387_v49 = vld [vmem:[#allocation8 + $0x1c4] ss:$8 sps:$4 sm:$0xff]   ;;  %v1382_v50 = vld [vmem:[#allocation8 + $0xc0] ss:$8 sps:$4 sm:$0xff]  }
  0x64   :  { %v1385_v51 = vld [vmem:[#allocation8 + $0x1c0] ss:$8 sps:$4 sm:$0xff]  }
  0x66   :  { %507 = vmatpush2.bf16.msra.mxu0 %v1296_v52  ;;  %548 = vmatpush2.bf16.msra.mxu1 %v1297_v53  ;;  %v1390_v52 = vld [vmem:[#allocation8 + $0xb4] ss:$8 sps:$4 sm:$0xff]  }
  0x67   :  { %508 = vmatprep.subr.bf16.mxu0 %v1298_v54  ;;  %549 = vmatprep.subr.bf16.mxu1 %v1300_v55  ;;  %v1393_v53 = vld [vmem:[#allocation8 + $0x1b4] ss:$8 sps:$4 sm:$0xff]   ;;  %v1388_v54 = vld [vmem:[#allocation8 + $0xb0] ss:$8 sps:$4 sm:$0xff]  }
  0x68   :  { %v1391_v55 = vld [vmem:[#allocation8 + $0x1b0] ss:$8 sps:$4 sm:$0xff]  }
  0x6a   :  { %509 = vmatpush2.bf16.msra.mxu0 %v1302_v56  ;;  %550 = vmatpush2.bf16.msra.mxu1 %v1303_v57  ;;  %v1396_v56 = vld [vmem:[#allocation8 + $0xa4] ss:$8 sps:$4 sm:$0xff]  }
  0x6b   :  { %510 = vmatprep.subr.bf16.mxu0 %v1304_v58  ;;  %551 = vmatprep.subr.bf16.mxu1 %v1306_v59  ;;  %v1399_v57 = vld [vmem:[#allocation8 + $0x1a4] ss:$8 sps:$4 sm:$0xff]   ;;  %v1394_v58 = vld [vmem:[#allocation8 + $0xa0] ss:$8 sps:$4 sm:$0xff]  }
  0x6c   :  { %v1397_v59 = vld [vmem:[#allocation8 + $0x1a0] ss:$8 sps:$4 sm:$0xff]  }
  0x6e   :  { %511 = vmatpush2.bf16.msra.mxu0 %v1308_v60  ;;  %552 = vmatpush2.bf16.msra.mxu1 %v1309_v61  ;;  %v1402_v60 = vld [vmem:[#allocation8 + $0x94] ss:$8 sps:$4 sm:$0xff]  }
  0x6f   :  { %512 = vmatprep.subr.bf16.mxu0 %v1310_v62  ;;  %553 = vmatprep.subr.bf16.mxu1 %v1312_v63  ;;  %v1405_v61 = vld [vmem:[#allocation8 + $0x194] ss:$8 sps:$4 sm:$0xff]   ;;  %v1400_v62 = vld [vmem:[#allocation8 + $0x90] ss:$8 sps:$4 sm:$0xff]  }
  0x70   :  { %v1403_v63 = vld [vmem:[#allocation8 + $0x190] ss:$8 sps:$4 sm:$0xff]  }
  0x72   :  { %513 = vmatpush2.bf16.msra.mxu0 %v1314_v0  ;;  %554 = vmatpush2.bf16.msra.mxu1 %v1315_v1  ;;  %v1406_v0 = vld [vmem:[#allocation8 + $0x80] ss:$8 sps:$4 sm:$0xff]   ;;  %v1408_v1 = vld [vmem:[#allocation8 + $0x84] ss:$8 sps:$4 sm:$0xff]  }
  0x73   :  { %976 = vmatprep.subr.bf16.mxu0 %v1318_v3  ;;  %1017 = vmatprep.subr.bf16.mxu1 %v1321_v4  ;;  %v1411_v3 = vld [vmem:[#allocation8 + $0x184] ss:$8 sps:$4 sm:$0xff]   ;;  %v142_v4 = vlaneseq }
  0x75   :  { %515 = vmatmul.mubr.bf16.vlgmr.msra.gmra.mxu0 %v74_v5  ;;  %556 = vmatmul.mubr.bf16.vlgmr.msra.gmra.mxu1 %v74_v5  ;;  %v143_v5 = vshrl.u32 %v142_v4, 7 }
  0x76   :  { %977 = vmatpush1.bf16.msra.mxu0 %v1316_v6  ;;  %1018 = vmatpush1.bf16.msra.mxu1 %v1319_v7 }
  0x77   :  { %978 = vmatprep.subr.bf16.mxu0 %v1324_v8  ;;  %1019 = vmatprep.subr.bf16.mxu1 %v1327_v9  ;;  %v144_v6 = vsub.s32 0, %v143_v5  ;;  %v152_v7 = vsub.s32 2, %v143_v5  ;;  %v140_v8 = vld [vmem:[#allocation7] sm:$0xf]  ;;  %v148_v9 = vsub.s32 1, %v143_v5 }
  0x7a   :  { %979 = vmatpush1.bf16.msra.mxu0 %v1322_v10  ;;  %1020 = vmatpush1.bf16.msra.mxu1 %v1325_v11  ;;  %v156_v10 = vsub.s32 3, %v143_v5  ;;  %v145_v11 = vrot.slane %v140_v8, %v144_v6 }
  0x7b   :  { %980 = vmatprep.subr.bf16.mxu0 %v1330_v12  ;;  %1021 = vmatprep.subr.bf16.mxu1 %v1333_v13  ;;  %v153_v12 = vrot.slane %v140_v8, %v152_v7 }
  0x7e   :  { %981 = vmatpush1.bf16.msra.mxu0 %v1328_v14  ;;  %1022 = vmatpush1.bf16.msra.mxu1 %v1331_v15  ;;  %v149_v15 = vrot.slane %v140_v8, %v148_v9 }
  0x7f   :  { %982 = vmatprep.subr.bf16.mxu0 %v1336_v16  ;;  %1023 = vmatprep.subr.bf16.mxu1 %v1339_v17  ;;  %v157_v16 = vrot.slane %v140_v8, %v156_v10 }
  0x82   :  { %983 = vmatpush1.bf16.msra.mxu0 %v1334_v18  ;;  %1024 = vmatpush1.bf16.msra.mxu1 %v1337_v19 }
  0x83   :  { %984 = vmatprep.subr.bf16.mxu0 %v1342_v20  ;;  %1025 = vmatprep.subr.bf16.mxu1 %v1345_v21 }
  0x86   :  { %985 = vmatpush1.bf16.msra.mxu0 %v1340_v22  ;;  %1026 = vmatpush1.bf16.msra.mxu1 %v1343_v23 }
  0x87   :  { %986 = vmatprep.subr.bf16.mxu0 %v1348_v24  ;;  %1027 = vmatprep.subr.bf16.mxu1 %v1351_v25 }
  0x8a   :  { %987 = vmatpush1.bf16.msra.mxu0 %v1346_v26  ;;  %1028 = vmatpush1.bf16.msra.mxu1 %v1349_v27 }
  0x8b   :  { %988 = vmatprep.subr.bf16.mxu0 %v1354_v28  ;;  %1029 = vmatprep.subr.bf16.mxu1 %v1357_v29 }
  0x8e   :  { %989 = vmatpush1.bf16.msra.mxu0 %v1352_v30  ;;  %1030 = vmatpush1.bf16.msra.mxu1 %v1355_v31 }
  0x8f   :  { %990 = vmatprep.subr.bf16.mxu0 %v1360_v32  ;;  %1031 = vmatprep.subr.bf16.mxu1 %v1363_v33 }
  0x92   :  { %991 = vmatpush1.bf16.msra.mxu0 %v1358_v34  ;;  %1032 = vmatpush1.bf16.msra.mxu1 %v1361_v35 }
  0x93   :  { %992 = vmatprep.subr.bf16.mxu0 %v1366_v36  ;;  %1033 = vmatprep.subr.bf16.mxu1 %v1369_v37 }
  0x96   :  { %993 = vmatpush2.bf16.msra.mxu0 %v1364_v38  ;;  %1034 = vmatpush2.bf16.msra.mxu1 %v1367_v39  ;;  %v644_v39 = vld [vmem:[%s1581_s4] sm:$0x3]  ;;  %s1492_s4 = scalar_lea.vmem %s1073_s16, 256 }
  0x97   :  { %994 = vmatprep.subr.bf16.mxu0 %v1372_v40  ;;  %1035 = vmatprep.subr.bf16.mxu1 %v1375_v41  ;;  %v649_v40 = vrot.slane %v644_v39, %v144_v6  ;;  %v653_v41 = vrot.slane %v644_v39, %v148_v9  ;;  %p1493_p6 = scmp.ne.s32.totalorder %s1073_s16, %s1492_s4  ;;  %p1498_p8 = scmp.lt.s32.totalorder %s1492_s4, %s1492_s4 }
  0x99   :  { %p1499_p9 = por %p1498_p8, %p1497_p7 }
  0x9a   :  { %995 = vmatpush2.bf16.msra.mxu0 %v1370_v42  ;;  %1036 = vmatpush2.bf16.msra.mxu1 %v1373_v43 }
  0x9b   :  { %996 = vmatprep.subr.bf16.mxu0 %v1378_v44  ;;  %1037 = vmatprep.subr.bf16.mxu1 %v1381_v45  ;;  %p1500_p10 = pnand %p1499_p9, %p1493_p6 }
  0x9e   :  { %997 = vmatpush2.bf16.msra.mxu0 %v1376_v46  ;;  %1038 = vmatpush2.bf16.msra.mxu1 %v1379_v47 }
  0x9f   :  { %998 = vmatprep.subr.bf16.mxu0 %v1384_v48  ;;  %1039 = vmatprep.subr.bf16.mxu1 %v1387_v49 }
  0xa2   :  { %999 = vmatpush2.bf16.msra.mxu0 %v1382_v50  ;;  %1040 = vmatpush2.bf16.msra.mxu1 %v1385_v51 }
  0xa3   :  { %1000 = vmatprep.subr.bf16.mxu0 %v1390_v52  ;;  %1041 = vmatprep.subr.bf16.mxu1 %v1393_v53 }
  0xa6   :  { %1001 = vmatpush2.bf16.msra.mxu0 %v1388_v54  ;;  %1042 = vmatpush2.bf16.msra.mxu1 %v1391_v55 }
  0xa7   :  { %1002 = vmatprep.subr.bf16.mxu0 %v1396_v56  ;;  %1043 = vmatprep.subr.bf16.mxu1 %v1399_v57 }
  0xaa   :  { %1003 = vmatpush2.bf16.msra.mxu0 %v1394_v58  ;;  %1044 = vmatpush2.bf16.msra.mxu1 %v1397_v59 }
  0xab   :  { %1004 = vmatprep.subr.bf16.mxu0 %v1402_v60  ;;  %1045 = vmatprep.subr.bf16.mxu1 %v1405_v61 }
  0xae   :  { %1005 = vmatpush2.bf16.msra.mxu0 %v1400_v62  ;;  %1046 = vmatpush2.bf16.msra.mxu1 %v1403_v63 }
  0xaf   :  { %1006 = vmatprep.subr.bf16.mxu0 %v1408_v1  ;;  %1047 = vmatprep.subr.bf16.mxu1 %v1411_v3 }
  0xb2   :  { %1007 = vmatpush2.bf16.msra.mxu0 %v1406_v0  ;;  %1048 = vmatpush2.bf16.msra.mxu1 %v1409_v2 }
 0x135   :  { %v516_v13 = vpop.f32.mrf.mxu0  ;;  %v557_v14 = vpop.f32.mrf.mxu1 }
 0x136   :  { %v517_v17 = vadd.f32 %v516_v13, %v145_v11  ;;  %v558_v18 = vadd.f32 %v557_v14, %v153_v12 }
 0x137   :  { %v518_v19 = vpop.f32.mrf.mxu0  ;;  %v559_v20 = vpop.f32.mrf.mxu1 }
 0x138   :  { %v568_v21 = vmul.f32 0.01, %v517_v17  ;;  %vm564_vm0 = vcmp.ge.f32.partialorder %v517_v17, 0.0  ;;  %v570_v22 = vmul.f32 0.01, %v558_v18  ;;  %v519_v23 = vadd.f32 %v518_v19, %v149_v15 }
 0x139   :  { %v560_v24 = vadd.f32 %v559_v20, %v157_v16  ;;  %v520_v25 = vpop.f32.mrf.mxu0  ;;  %v561_v26 = vpop.f32.mrf.mxu1  ;;  %vm566_vm1 = vcmp.ge.f32.partialorder %v558_v18, 0.0 }
 0x13a   :  { %vm565_vm2 = vcmp.ge.f32.partialorder %v519_v23, 0.0  ;;  %v569_v27 = vmul.f32 0.01, %v519_v23  ;;  %v572_v30 = vsel %vm564_vm0, %v517_v17, %v568_v21  ;;  %v574_v32 = vsel %vm566_vm1, %v558_v18, %v570_v22 }
 0x13b   :  { %v521_v28 = vpop.f32.mrf.mxu0  ;;  %v562_v29 = vpop.f32.mrf.mxu1  ;;  %vm567_vm3 = vcmp.ge.f32.partialorder %v560_v24, 0.0  ;;  %v571_v31 = vmul.f32 0.01, %v560_v24  ;;  %v576_v36 = vpack.c.bf16 %v572_v30, %v572_v30  ;;  %v578_v38 = vpack.c.bf16 %v574_v32, %v574_v32 }
 0x13c   :  { %v573_v33 = vsel %vm565_vm2, %v519_v23, %v569_v27 }
 0x13d   :  { %v577_v34 = vpack.c.bf16 %v573_v33, %v573_v33  ;;  %v575_v35 = vsel %vm567_vm3, %v560_v24, %v571_v31 }
 0x13e   :  { %v579_v37 = vpack.c.bf16 %v575_v35, %v575_v35 }
 0x13f   :  { %1008 = vmatprep.mubr.bf16.mxu0 %v577_v34 }
 0x140   :  { %1049 = vmatprep.mubr.bf16.mxu1 %v579_v37  ;;  %1009 = vmatmul.mubr.bf16.vlgmr.msra.gmra.mxu0 %v576_v36 }
 0x141   :  { %1050 = vmatmul.mubr.bf16.vlgmr.msra.gmra.mxu1 %v578_v38 }
 0x200   :  { %v1010_v42 = vpop.f32.mrf.mxu0 }
 0x201   :  { %v1011_v43 = vadd.f32 %v1010_v42, %v649_v40  ;;  %v1051_v44 = vpop.f32.mrf.mxu1 }
 0x202   :  { %v1012_v45 = vpop.f32.mrf.mxu0 }
 0x203   :  { %v1052_v46 = vadd.f32 %v1051_v44, %v1011_v43  ;;  %v1013_v47 = vadd.f32 %v1012_v45, %v653_v41  ;;  %v1053_v48 = vpop.f32.mrf.mxu1 }
 0x204   :  { %v1014_v49 = vpop.f32.mrf.mxu0 }
 0x205   :  { %vm1058_vm4 = vcmp.ge.f32.partialorder %v1052_v46, 0.0  ;;  %v1060_v50 = vmul.f32 0.01, %v1052_v46  ;;  %v1054_v51 = vadd.f32 %v1053_v48, %v1013_v47  ;;  %v1055_v52 = vpop.f32.mrf.mxu1 }
 0x206   :  { %v1015_v53 = vpop.f32.mrf.mxu0 }
 0x207   :  { %vm1059_vm5 = vcmp.ge.f32.partialorder %v1054_v51, 0.0  ;;  %v1061_v54 = vmul.f32 0.01, %v1054_v51  ;;  %v1056_v55 = vpop.f32.mrf.mxu1  ;;  %v1062_v56 = vsel %vm1058_vm4, %v1052_v46, %v1060_v50 }
 0x208   :  { %1064 = vst [vmem:[#allocation10] sm:$0xff] %v1062_v56 }
 0x209   :  { %v1063_v57 = vsel %vm1059_vm5, %v1054_v51, %v1061_v54 }
 0x20a   :  { %1065 = vst [vmem:[#allocation10 + $0x8] sm:$0xff] %v1063_v57 }
 0x20b   :  { %1503 = shalt.err (!%p1500_p10)
}
 0x20c   :  { %1075 = dma.vmem_to_hbm [thread:$0]  %s1073_s16, 256, %s1582_s5, [#allocation4]  }
 0x20d   :  { %1518 = dma.done.wait [#allocation4], 256  }
 0x20e   :  { %1519 = vsyncadd [#allocation4], 4294967040 }
 0x20f   :  { %1079 = vsyncpa [#allocation3], 1 }
 0x210   :  { %1080 = vsyncpa [#allocation6], 1 }
 0x211   :  { %1081 = vsyncpa [#allocation9], 1 }
 0x212   :  { %1082 = vsyncpa [#allocation4], 1 }

// kernel: tpu_custom_call.1
= control target key start
LH: loop header
LB: loop body
LE: loop exit
PB: predicated region body
PF: predicated region fallthrough
CT: control target
= control target key end

     0   :  { %10 = vsyncpa [#allocation3], 0  ;;  %s1577_s0 = inlined_call_operand.hbm [shape: f32[8,256], index: 0, kind: input, shape index: {}]   ;;  %s1578_s1 = inlined_call_operand.hbm [shape: bf16[256,512], index: 1, kind: input, shape index: {}]   ;;  %s1579_s2 = inlined_call_operand.hbm [shape: f32[1,512], index: 2, kind: input, shape index: {}]   ;;  %s1580_s3 = inlined_call_operand.hbm [shape: bf16[512,256], index: 3, kind: input, shape index: {}]   ;;  %s1581_s4 = inlined_call_operand.vmem [shape: f32[1,256], index: 4, kind: input, shape index: {}]   ;;  %s1582_s5 = inlined_call_operand.hbm [shape: f32[8,256], index: 5, kind: output, shape index: {}]  }
   0x1   :  { %11 = vsyncpa [#allocation6], 0 }
   0x2   :  { %12 = vsyncpa [#allocation9], 0 }
   0x3   :  { %13 = vsyncpa [#allocation4], 0  ;;  %s1520_s18 = smov [#allocation5]  }
   0x4   :  { %s29_s19 = sshll.u32 %s1520_s18, 4  ;;  %s30_s19 = int_to_ptr.vmem [resolvable:$true] %s29_s19 }
   0x5   :  { %s1420_s20 = scalar_lea.vmem %s30_s19, 8192  ;;  %p1425_p1 = scmp.lt.s32.totalorder %s30_s19, %s30_s19 }
   0x6   :  { %p1421_p0 = scmp.ne.s32.totalorder %s30_s19, %s1420_s20  ;;  %p1426_p2 = scmp.lt.s32.totalorder %s1420_s20, %s1420_s20 }
   0x8   :  { %p1427_p3 = por %p1426_p2, %p1425_p1 }
   0xa   :  { %p1428_p4 = pnand %p1427_p3, %p1421_p0 }
   0xc   :  { %1431 = shalt.err (!%p1428_p4)
}
   0xd   :  { %s1521_s21 = smov 256   ;;  %s1522_s22 = smov 16  }
   0xe   :  { %35 = dma.hbm_to_vmem [thread:$0]  %s1578_s1, 8192, %s30_s19, [#allocation6], %s1521_s21, %s1521_s21, %s1522_s22  }
   0xf   :  { %s1523_s25 = smov [#allocation2]   ;;  %s1524_s27 = smov [#allocation7]  }
  0x10   :  { %s20_s26 = sshll.u32 %s1523_s25, 4  ;;  %s42_s28 = sshll.u32 %s1524_s27, 4  ;;  %s21_s26 = int_to_ptr.vmem [resolvable:$true] %s20_s26  ;;  %s43_s28 = int_to_ptr.vmem [resolvable:$true] %s42_s28 }
  0x11   :  { %s1440_s29 = scalar_lea.vmem %s21_s26, 256  ;;  %p1445_p6 = scmp.lt.s32.totalorder %s21_s26, %s21_s26 }
  0x12   :  { %p1441_p5 = scmp.ne.s32.totalorder %s21_s26, %s1440_s29  ;;  %p1446_p7 = scmp.lt.s32.totalorder %s1440_s29, %s1440_s29 }
  0x14   :  { %p1447_p8 = por %p1446_p7, %p1445_p6 }
  0x16   :  { %p1448_p9 = pnand %p1447_p8, %p1441_p5 }
  0x18   :  { %1451 = shalt.err (!%p1448_p9)
}
  0x19   :  { %23 = dma.hbm_to_vmem [thread:$0]  %s1577_s0, 256, %s21_s26, [#allocation3]  }
  0x1a   :  { %s1460_s7 = scalar_lea.vmem %s43_s28, 64  ;;  %p1465_p11 = scmp.lt.s32.totalorder %s43_s28, %s43_s28 }
  0x1b   :  { %p1461_p10 = scmp.ne.s32.totalorder %s43_s28, %s1460_s7  ;;  %p1466_p12 = scmp.lt.s32.totalorder %s1460_s7, %s1460_s7 }
  0x1d   :  { %p1467_p13 = por %p1466_p12, %p1465_p11 }
  0x1f   :  { %p1468_p0 = pnand %p1467_p13, %p1461_p10 }
  0x21   :  { %1471 = shalt.err (!%p1468_p0)
}
  0x22   :  { %45 = dma.hbm_to_vmem [thread:$0]  %s1579_s2, 64, %s43_s28, [#allocation6]  }
  0x23   :  { %s1525_s9 = smov [#allocation8]  }
  0x24   :  { %s51_s10 = sshll.u32 %s1525_s9, 4  ;;  %s52_s10 = int_to_ptr.vmem [resolvable:$true] %s51_s10 }
  0x25   :  { %s1480_s11 = scalar_lea.vmem %s52_s10, 8192  ;;  %p1485_p2 = scmp.lt.s32.totalorder %s52_s10, %s52_s10 }
  0x26   :  { %p1481_p1 = scmp.ne.s32.totalorder %s52_s10, %s1480_s11  ;;  %p1486_p3 = scmp.lt.s32.totalorder %s1480_s11, %s1480_s11 }
  0x28   :  { %p1487_p4 = por %p1486_p3, %p1485_p2 }
  0x2a   :  { %p1488_p5 = pnand %p1487_p4, %p1481_p1 }
  0x2c   :  { %1491 = shalt.err (!%p1488_p5)
}
  0x2d   :  { %s1526_s0 = smov 128   ;;  %s1527_s12 = smov 8  }
  0x2e   :  { %57 = dma.hbm_to_vmem [thread:$0]  %s1580_s3, 8192, %s52_s10, [#allocation9], %s1526_s0, %s1526_s0, %s1527_s12  }
  0x2f   :  { %1512 = dma.done.wait [#allocation3], 256  }
  0x30   :  { %1513 = vsyncadd [#allocation3], 4294967040 }
  0x31   :  { %1514 = dma.done.wait [#allocation6], 8256  }
  0x32   :  { %1515 = vsyncadd [#allocation6], 4294959040 }
  0x33   :  { %1516 = dma.done.wait [#allocation9], 8192  }
  0x34   :  { %1517 = vsyncadd [#allocation9], 4294959104  ;;  %v1220_v0 = vld [vmem:[#allocation5 + $0xe4] ss:$16 sps:$4 sm:$0xff]   ;;  %v1222_v1 = vld [vmem:[#allocation5 + $0xec] ss:$16 sps:$4 sm:$0xff]  }
  0x35   :  { %482 = vmatprep.subr.bf16.mxu0 %v1220_v0  ;;  %v1224_v2 = vld [vmem:[#allocation5 + $0xe0] ss:$16 sps:$4 sm:$0xff]   ;;  %v1225_v3 = vld [vmem:[#allocation5 + $0xe8] ss:$16 sps:$4 sm:$0xff]   ;;  %523 = vmatprep.subr.bf16.mxu1 %v1222_v1  ;;  %v1226_v4 = vld [vmem:[#allocation5 + $0xc4] ss:$16 sps:$4 sm:$0xff]  }
  0x36   :  { %483 = vmatpush1.bf16.msra.mxu0 %v1224_v2  ;;  %524 = vmatpush1.bf16.msra.mxu1 %v1225_v3  ;;  %v1228_v5 = vld [vmem:[#allocation5 + $0xcc] ss:$16 sps:$4 sm:$0xff]   ;;  %v1230_v6 = vld [vmem:[#allocation5 + $0xc0] ss:$16 sps:$4 sm:$0xff]   ;;  %v1231_v7 = vld [vmem:[#allocation5 + $0xc8] ss:$16 sps:$4 sm:$0xff]  }
  0x37   :  { %484 = vmatprep.subr.bf16.mxu0 %v1226_v4  ;;  %525 = vmatprep.subr.bf16.mxu1 %v1228_v5  ;;  %v1232_v8 = vld [vmem:[#allocation5 + $0xa4] ss:$16 sps:$4 sm:$0xff]   ;;  %v1234_v9 = vld [vmem:[#allocation5 + $0xac] ss:$16 sps:$4 sm:$0xff]   ;;  %v1236_v10 = vld [vmem:[#allocation5 + $0xa0] ss:$16 sps:$4 sm:$0xff]  }
  0x38   :  { %v1237_v11 = vld [vmem:[#allocation5 + $0xa8] ss:$16 sps:$4 sm:$0xff]   ;;  %v1238_v12 = vld [vmem:[#allocation5 + $0x84] ss:$16 sps:$4 sm:$0xff]   ;;  %v1240_v13 = vld [vmem:[#allocation5 + $0x8c] ss:$16 sps:$4 sm:$0xff]  }
  0x39   :  { %v1242_v14 = vld [vmem:[#allocation5 + $0x80] ss:$16 sps:$4 sm:$0xff]   ;;  %v1243_v15 = vld [vmem:[#allocation5 + $0x88] ss:$16 sps:$4 sm:$0xff]   ;;  %v1244_v16 = vld [vmem:[#allocation5 + $0x64] ss:$16 sps:$4 sm:$0xff]  }
  0x3a   :  { %485 = vmatpush1.bf16.msra.mxu0 %v1230_v6  ;;  %526 = vmatpush1.bf16.msra.mxu1 %v1231_v7  ;;  %v1246_v17 = vld [vmem:[#allocation5 + $0x6c] ss:$16 sps:$4 sm:$0xff]   ;;  %v1248_v18 = vld [vmem:[#allocation5 + $0x60] ss:$16 sps:$4 sm:$0xff]   ;;  %v1249_v19 = vld [vmem:[#allocation5 + $0x68] ss:$16 sps:$4 sm:$0xff]  }
  0x3b   :  { %486 = vmatprep.subr.bf16.mxu0 %v1232_v8  ;;  %527 = vmatprep.subr.bf16.mxu1 %v1234_v9  ;;  %v1250_v20 = vld [vmem:[#allocation5 + $0x44] ss:$16 sps:$4 sm:$0xff]   ;;  %v1252_v21 = vld [vmem:[#allocation5 + $0x4c] ss:$16 sps:$4 sm:$0xff]   ;;  %v1254_v22 = vld [vmem:[#allocation5 + $0x40] ss:$16 sps:$4 sm:$0xff]  }
  0x3c   :  { %v1255_v23 = vld [vmem:[#allocation5 + $0x48] ss:$16 sps:$4 sm:$0xff]   ;;  %v1256_v24 = vld [vmem:[#allocation5 + $0x24] ss:$16 sps:$4 sm:$0xff]   ;;  %v1258_v25 = vld [vmem:[#allocation5 + $0x2c] ss:$16 sps:$4 sm:$0xff]  }
  0x3d   :  { %v1260_v26 = vld [vmem:[#allocation5 + $0x20] ss:$16 sps:$4 sm:$0xff]   ;;  %v1261_v27 = vld [vmem:[#allocation5 + $0x28] ss:$16 sps:$4 sm:$0xff]   ;;  %v1262_v28 = vld [vmem:[#allocation5 + $0x4] ss:$16 sps:$4 sm:$0xff]  }
  0x3e   :  { %487 = vmatpush1.bf16.msra.mxu0 %v1236_v10  ;;  %528 = vmatpush1.bf16.msra.mxu1 %v1237_v11  ;;  %v1264_v29 = vld [vmem:[#allocation5 + $0xc] ss:$16 sps:$4 sm:$0xff]   ;;  %v1266_v30 = vld [vmem:[#allocation5] ss:$16 sps:$4 sm:$0xff]   ;;  %v1267_v31 = vld [vmem:[#allocation5 + $0x8] ss:$16 sps:$4 sm:$0xff]  }
  0x3f   :  { %488 = vmatprep.subr.bf16.mxu0 %v1238_v12  ;;  %529 = vmatprep.subr.bf16.mxu1 %v1240_v13  ;;  %v1268_v32 = vld [vmem:[#allocation5 + $0x1e4] ss:$16 sps:$4 sm:$0xff]   ;;  %v1270_v33 = vld [vmem:[#allocation5 + $0x1ec] ss:$16 sps:$4 sm:$0xff]   ;;  %v1272_v34 = vld [vmem:[#allocation5 + $0x1e0] ss:$16 sps:$4 sm:$0xff]  }
  0x40   :  { %v1273_v35 = vld [vmem:[#allocation5 + $0x1e8] ss:$16 sps:$4 sm:$0xff]   ;;  %v1274_v36 = vld [vmem:[#allocation5 + $0x1c4] ss:$16 sps:$4 sm:$0xff]   ;;  %v1276_v37 = vld [vmem:[#allocation5 + $0x1cc] ss:$16 sps:$4 sm:$0xff]  }
  0x41   :  { %v1278_v38 = vld [vmem:[#allocation5 + $0x1c0] ss:$16 sps:$4 sm:$0xff]   ;;  %v1279_v39 = vld [vmem:[#allocation5 + $0x1c8] ss:$16 sps:$4 sm:$0xff]   ;;  %v1280_v40 = vld [vmem:[#allocation5 + $0x1a4] ss:$16 sps:$4 sm:$0xff]  }
  0x42   :  { %489 = vmatpush1.bf16.msra.mxu0 %v1242_v14  ;;  %530 = vmatpush1.bf16.msra.mxu1 %v1243_v15  ;;  %v1282_v41 = vld [vmem:[#allocation5 + $0x1ac] ss:$16 sps:$4 sm:$0xff]   ;;  %v1284_v42 = vld [vmem:[#allocation5 + $0x1a0] ss:$16 sps:$4 sm:$0xff]   ;;  %v1285_v43 = vld [vmem:[#allocation5 + $0x1a8] ss:$16 sps:$4 sm:$0xff]  }
  0x43   :  { %490 = vmatprep.subr.bf16.mxu0 %v1244_v16  ;;  %531 = vmatprep.subr.bf16.mxu1 %v1246_v17  ;;  %v1286_v44 = vld [vmem:[#allocation5 + $0x184] ss:$16 sps:$4 sm:$0xff]   ;;  %v1288_v45 = vld [vmem:[#allocation5 + $0x18c] ss:$16 sps:$4 sm:$0xff]   ;;  %v1290_v48 = vld [vmem:[#allocation5 + $0x180] ss:$16 sps:$4 sm:$0xff]  }
  0x44   :  { %v73_v46 = vld [vmem:[#allocation2 + $0x8] sm:$0xff]  ;;  %v1292_v50 = vld [vmem:[#allocation5 + $0x164] ss:$16 sps:$4 sm:$0xff]   ;;  %v1296_v52 = vld [vmem:[#allocation5 + $0x160] ss:$16 sps:$4 sm:$0xff]   ;;  %s1528_s15 = smov [#allocation10]  }
  0x45   :  { %v75_v47 = vpack.c.bf16 %v73_v46, %v73_v46  ;;  %v1291_v49 = vld [vmem:[#allocation5 + $0x188] ss:$16 sps:$4 sm:$0xff]   ;;  %v1294_v51 = vld [vmem:[#allocation5 + $0x16c] ss:$16 sps:$4 sm:$0xff]   ;;  %v1298_v54 = vld [vmem:[#allocation5 + $0x144] ss:$16 sps:$4 sm:$0xff]  }
  0x46   :  { %491 = vmatpush1.bf16.msra.mxu0 %v1248_v18  ;;  %532 = vmatpush1.bf16.msra.mxu1 %v1249_v19  ;;  %v1297_v53 = vld [vmem:[#allocation5 + $0x168] ss:$16 sps:$4 sm:$0xff]   ;;  %v1300_v55 = vld [vmem:[#allocation5 + $0x14c] ss:$16 sps:$4 sm:$0xff]   ;;  %v1302_v56 = vld [vmem:[#allocation5 + $0x140] ss:$16 sps:$4 sm:$0xff]  }
  0x47   :  { %492 = vmatprep.subr.bf16.mxu0 %v1250_v20  ;;  %533 = vmatprep.subr.bf16.mxu1 %v1252_v21  ;;  %v1303_v57 = vld [vmem:[#allocation5 + $0x148] ss:$16 sps:$4 sm:$0xff]   ;;  %v1304_v58 = vld [vmem:[#allocation5 + $0x124] ss:$16 sps:$4 sm:$0xff]   ;;  %v1306_v59 = vld [vmem:[#allocation5 + $0x12c] ss:$16 sps:$4 sm:$0xff]  }
  0x48   :  { %514 = vmatprep.mubr.bf16.mxu0 %v75_v47  ;;  %555 = vmatprep.mubr.bf16.mxu1 %v75_v47  ;;  %v1308_v60 = vld [vmem:[#allocation5 + $0x120] ss:$16 sps:$4 sm:$0xff]   ;;  %v1309_v61 = vld [vmem:[#allocation5 + $0x128] ss:$16 sps:$4 sm:$0xff]   ;;  %v1310_v62 = vld [vmem:[#allocation5 + $0x104] ss:$16 sps:$4 sm:$0xff]  }
  0x49   :  { %v1312_v63 = vld [vmem:[#allocation5 + $0x10c] ss:$16 sps:$4 sm:$0xff]   ;;  %v1314_v0 = vld [vmem:[#allocation5 + $0x100] ss:$16 sps:$4 sm:$0xff]   ;;  %v1315_v1 = vld [vmem:[#allocation5 + $0x108] ss:$16 sps:$4 sm:$0xff]  }
  0x4a   :  { %493 = vmatpush1.bf16.msra.mxu0 %v1254_v22  ;;  %534 = vmatpush1.bf16.msra.mxu1 %v1255_v23  ;;  %v72_v2 = vld [vmem:[#allocation2] sm:$0xff]  ;;  %v1318_v3 = vld [vmem:[#allocation8 + $0x74] ss:$8 sps:$4 sm:$0xff]   ;;  %v1322_v10 = vld [vmem:[#allocation8 + $0x60] ss:$8 sps:$4 sm:$0xff]   ;;  %s1072_s16 = sshll.u32 %s1528_s15, 4  ;;  %s1073_s16 = int_to_ptr.vmem [resolvable:$true] %s1072_s16 }
  0x4b   :  { %494 = vmatprep.subr.bf16.mxu0 %v1256_v24  ;;  %535 = vmatprep.subr.bf16.mxu1 %v1258_v25  ;;  %v1321_v4 = vld [vmem:[#allocation8 + $0x174] ss:$8 sps:$4 sm:$0xff]   ;;  %v74_v5 = vpack.c.bf16 %v72_v2, %v72_v2  ;;  %v1316_v6 = vld [vmem:[#allocation8 + $0x70] ss:$8 sps:$4 sm:$0xff]   ;;  %v1324_v8 = vld [vmem:[#allocation8 + $0x64] ss:$8 sps:$4 sm:$0xff]   ;;  %p1497_p7 = scmp.lt.s32.totalorder %s1073_s16, %s1073_s16 }
  0x4c   :  { %v1319_v7 = vld [vmem:[#allocation8 + $0x170] ss:$8 sps:$4 sm:$0xff]   ;;  %v1327_v9 = vld [vmem:[#allocation8 + $0x164] ss:$8 sps:$4 sm:$0xff]   ;;  %v1325_v11 = vld [vmem:[#allocation8 + $0x160] ss:$8 sps:$4 sm:$0xff]  }
  0x4d   :  { %v1330_v12 = vld [vmem:[#allocation8 + $0x54] ss:$8 sps:$4 sm:$0xff]   ;;  %v1328_v14 = vld [vmem:[#allocation8 + $0x50] ss:$8 sps:$4 sm:$0xff]   ;;  %v1336_v16 = vld [vmem:[#allocation8 + $0x44] ss:$8 sps:$4 sm:$0xff]  }
  0x4e   :  { %495 = vmatpush1.bf16.msra.mxu0 %v1260_v26  ;;  %536 = vmatpush1.bf16.msra.mxu1 %v1261_v27  ;;  %v1333_v13 = vld [vmem:[#allocation8 + $0x154] ss:$8 sps:$4 sm:$0xff]   ;;  %v1331_v15 = vld [vmem:[#allocation8 + $0x150] ss:$8 sps:$4 sm:$0xff]   ;;  %v1339_v17 = vld [vmem:[#allocation8 + $0x144] ss:$8 sps:$4 sm:$0xff]  }
  0x4f   :  { %496 = vmatprep.subr.bf16.mxu0 %v1262_v28  ;;  %537 = vmatprep.subr.bf16.mxu1 %v1264_v29  ;;  %v1334_v18 = vld [vmem:[#allocation8 + $0x40] ss:$8 sps:$4 sm:$0xff]   ;;  %v1342_v20 = vld [vmem:[#allocation8 + $0x34] ss:$8 sps:$4 sm:$0xff]   ;;  %v1340_v22 = vld [vmem:[#allocation8 + $0x30] ss:$8 sps:$4 sm:$0xff]  }
  0x50   :  { %v1337_v19 = vld [vmem:[#allocation8 + $0x140] ss:$8 sps:$4 sm:$0xff]   ;;  %v1345_v21 = vld [vmem:[#allocation8 + $0x134] ss:$8 sps:$4 sm:$0xff]   ;;  %v1343_v23 = vld [vmem:[#allocation8 + $0x130] ss:$8 sps:$4 sm:$0xff]  }
  0x51   :  { %v1348_v24 = vld [vmem:[#allocation8 + $0x24] ss:$8 sps:$4 sm:$0xff]   ;;  %v1346_v26 = vld [vmem:[#allocation8 + $0x20] ss:$8 sps:$4 sm:$0xff]   ;;  %v1354_v28 = vld [vmem:[#allocation8 + $0x14] ss:$8 sps:$4 sm:$0xff]  }
  0x52   :  { %497 = vmatpush1.bf16.msra.mxu0 %v1266_v30  ;;  %538 = vmatpush1.bf16.msra.mxu1 %v1267_v31  ;;  %v1351_v25 = vld [vmem:[#allocation8 + $0x124] ss:$8 sps:$4 sm:$0xff]   ;;  %v1349_v27 = vld [vmem:[#allocation8 + $0x120] ss:$8 sps:$4 sm:$0xff]   ;;  %v1357_v29 = vld [vmem:[#allocation8 + $0x114] ss:$8 sps:$4 sm:$0xff]  }
  0x53   :  { %498 = vmatprep.subr.bf16.mxu0 %v1268_v32  ;;  %539 = vmatprep.subr.bf16.mxu1 %v1270_v33  ;;  %v1352_v30 = vld [vmem:[#allocation8 + $0x10] ss:$8 sps:$4 sm:$0xff]   ;;  %v1360_v32 = vld [vmem:[#allocation8 + $0x4] ss:$8 sps:$4 sm:$0xff]   ;;  %v1409_v2 = vld [vmem:[#allocation8 + $0x180] ss:$8 sps:$4 sm:$0xff]  }
  0x54   :  { %v1355_v31 = vld [vmem:[#allocation8 + $0x110] ss:$8 sps:$4 sm:$0xff]   ;;  %v1363_v33 = vld [vmem:[#allocation8 + $0x104] ss:$8 sps:$4 sm:$0xff]  }
  0x55   :  { %v1376_v46 = vld [vmem:[#allocation8 + $0xd0] ss:$8 sps:$4 sm:$0xff]  }
  0x56   :  { %499 = vmatpush2.bf16.msra.mxu0 %v1272_v34  ;;  %540 = vmatpush2.bf16.msra.mxu1 %v1273_v35  ;;  %v1358_v34 = vld [vmem:[#allocation8] ss:$8 sps:$4 sm:$0xff]   ;;  %v1379_v47 = vld [vmem:[#allocation8 + $0x1d0] ss:$8 sps:$4 sm:$0xff]  }
  0x57   :  { %500 = vmatprep.subr.bf16.mxu0 %v1274_v36  ;;  %541 = vmatprep.subr.bf16.mxu1 %v1276_v37  ;;  %v1361_v35 = vld [vmem:[#allocation8 + $0x100] ss:$8 sps:$4 sm:$0xff]   ;;  %v1366_v36 = vld [vmem:[#allocation8 + $0xf4] ss:$8 sps:$4 sm:$0xff]  }
  0x58   :  { %v1369_v37 = vld [vmem:[#allocation8 + $0x1f4] ss:$8 sps:$4 sm:$0xff]  }
  0x5a   :  { %501 = vmatpush2.bf16.msra.mxu0 %v1278_v38  ;;  %542 = vmatpush2.bf16.msra.mxu1 %v1279_v39  ;;  %v1364_v38 = vld [vmem:[#allocation8 + $0xf0] ss:$8 sps:$4 sm:$0xff]  }
  0x5b   :  { %502 = vmatprep.subr.bf16.mxu0 %v1280_v40  ;;  %543 = vmatprep.subr.bf16.mxu1 %v1282_v41  ;;  %v1367_v39 = vld [vmem:[#allocation8 + $0x1f0] ss:$8 sps:$4 sm:$0xff]   ;;  %v1372_v40 = vld [vmem:[#allocation8 + $0xe4] ss:$8 sps:$4 sm:$0xff]  }
  0x5c   :  { %v1375_v41 = vld [vmem:[#allocation8 + $0x1e4] ss:$8 sps:$4 sm:$0xff]  }
  0x5e   :  { %503 = vmatpush2.bf16.msra.mxu0 %v1284_v42  ;;  %544 = vmatpush2.bf16.msra.mxu1 %v1285_v43  ;;  %v1370_v42 = vld [vmem:[#allocation8 + $0xe0] ss:$8 sps:$4 sm:$0xff]  }
  0x5f   :  { %504 = vmatprep.subr.bf16.mxu0 %v1286_v44  ;;  %545 = vmatprep.subr.bf16.mxu1 %v1288_v45  ;;  %v1373_v43 = vld [vmem:[#allocation8 + $0x1e0] ss:$8 sps:$4 sm:$0xff]   ;;  %v1378_v44 = vld [vmem:[#allocation8 + $0xd4] ss:$8 sps:$4 sm:$0xff]  }
  0x60   :  { %v1381_v45 = vld [vmem:[#allocation8 + $0x1d4] ss:$8 sps:$4 sm:$0xff]  }
  0x62   :  { %505 = vmatpush2.bf16.msra.mxu0 %v1290_v48  ;;  %546 = vmatpush2.bf16.msra.mxu1 %v1291_v49  ;;  %v1384_v48 = vld [vmem:[#allocation8 + $0xc4] ss:$8 sps:$4 sm:$0xff]  }
  0x63   :  { %506 = vmatprep.subr.bf16.mxu0 %v1292_v50  ;;  %547 = vmatprep.subr.bf16.mxu1 %v1294_v51  ;;  %v1387_v49 = vld [vmem:[#allocation8 + $0x1c4] ss:$8 sps:$4 sm:$0xff]   ;;  %v1382_v50 = vld [vmem:[#allocation8 + $0xc0] ss:$8 sps:$4 sm:$0xff]  }
  0x64   :  { %v1385_v51 = vld [vmem:[#allocation8 + $0x1c0] ss:$8 sps:$4 sm:$0xff]  }
  0x66   :  { %507 = vmatpush2.bf16.msra.mxu0 %v1296_v52  ;;  %548 = vmatpush2.bf16.msra.mxu1 %v1297_v53  ;;  %v1390_v52 = vld [vmem:[#allocation8 + $0xb4] ss:$8 sps:$4 sm:$0xff]  }
  0x67   :  { %508 = vmatprep.subr.bf16.mxu0 %v1298_v54  ;;  %549 = vmatprep.subr.bf16.mxu1 %v1300_v55  ;;  %v1393_v53 = vld [vmem:[#allocation8 + $0x1b4] ss:$8 sps:$4 sm:$0xff]   ;;  %v1388_v54 = vld [vmem:[#allocation8 + $0xb0] ss:$8 sps:$4 sm:$0xff]  }
  0x68   :  { %v1391_v55 = vld [vmem:[#allocation8 + $0x1b0] ss:$8 sps:$4 sm:$0xff]  }
  0x6a   :  { %509 = vmatpush2.bf16.msra.mxu0 %v1302_v56  ;;  %550 = vmatpush2.bf16.msra.mxu1 %v1303_v57  ;;  %v1396_v56 = vld [vmem:[#allocation8 + $0xa4] ss:$8 sps:$4 sm:$0xff]  }
  0x6b   :  { %510 = vmatprep.subr.bf16.mxu0 %v1304_v58  ;;  %551 = vmatprep.subr.bf16.mxu1 %v1306_v59  ;;  %v1399_v57 = vld [vmem:[#allocation8 + $0x1a4] ss:$8 sps:$4 sm:$0xff]   ;;  %v1394_v58 = vld [vmem:[#allocation8 + $0xa0] ss:$8 sps:$4 sm:$0xff]  }
  0x6c   :  { %v1397_v59 = vld [vmem:[#allocation8 + $0x1a0] ss:$8 sps:$4 sm:$0xff]  }
  0x6e   :  { %511 = vmatpush2.bf16.msra.mxu0 %v1308_v60  ;;  %552 = vmatpush2.bf16.msra.mxu1 %v1309_v61  ;;  %v1402_v60 = vld [vmem:[#allocation8 + $0x94] ss:$8 sps:$4 sm:$0xff]  }
  0x6f   :  { %512 = vmatprep.subr.bf16.mxu0 %v1310_v62  ;;  %553 = vmatprep.subr.bf16.mxu1 %v1312_v63  ;;  %v1405_v61 = vld [vmem:[#allocation8 + $0x194] ss:$8 sps:$4 sm:$0xff]   ;;  %v1400_v62 = vld [vmem:[#allocation8 + $0x90] ss:$8 sps:$4 sm:$0xff]  }
  0x70   :  { %v1403_v63 = vld [vmem:[#allocation8 + $0x190] ss:$8 sps:$4 sm:$0xff]  }
  0x72   :  { %513 = vmatpush2.bf16.msra.mxu0 %v1314_v0  ;;  %554 = vmatpush2.bf16.msra.mxu1 %v1315_v1  ;;  %v1406_v0 = vld [vmem:[#allocation8 + $0x80] ss:$8 sps:$4 sm:$0xff]   ;;  %v1408_v1 = vld [vmem:[#allocation8 + $0x84] ss:$8 sps:$4 sm:$0xff]  }
  0x73   :  { %976 = vmatprep.subr.bf16.mxu0 %v1318_v3  ;;  %1017 = vmatprep.subr.bf16.mxu1 %v1321_v4  ;;  %v1411_v3 = vld [vmem:[#allocation8 + $0x184] ss:$8 sps:$4 sm:$0xff]   ;;  %v142_v4 = vlaneseq }
  0x75   :  { %515 = vmatmul.mubr.bf16.vlgmr.msra.gmra.mxu0 %v74_v5  ;;  %556 = vmatmul.mubr.bf16.vlgmr.msra.gmra.mxu1 %v74_v5  ;;  %v143_v5 = vshrl.u32 %v142_v4, 7 }
  0x76   :  { %977 = vmatpush1.bf16.msra.mxu0 %v1316_v6  ;;  %1018 = vmatpush1.bf16.msra.mxu1 %v1319_v7 }
  0x77   :  { %978 = vmatprep.subr.bf16.mxu0 %v1324_v8  ;;  %1019 = vmatprep.subr.bf16.mxu1 %v1327_v9  ;;  %v144_v6 = vsub.s32 0, %v143_v5  ;;  %v152_v7 = vsub.s32 2, %v143_v5  ;;  %v140_v8 = vld [vmem:[#allocation7] sm:$0xf]  ;;  %v148_v9 = vsub.s32 1, %v143_v5 }
  0x7a   :  { %979 = vmatpush1.bf16.msra.mxu0 %v1322_v10  ;;  %1020 = vmatpush1.bf16.msra.mxu1 %v1325_v11  ;;  %v156_v10 = vsub.s32 3, %v143_v5  ;;  %v145_v11 = vrot.slane %v140_v8, %v144_v6 }
  0x7b   :  { %980 = vmatprep.subr.bf16.mxu0 %v1330_v12  ;;  %1021 = vmatprep.subr.bf16.mxu1 %v1333_v13  ;;  %v153_v12 = vrot.slane %v140_v8, %v152_v7 }
  0x7e   :  { %981 = vmatpush1.bf16.msra.mxu0 %v1328_v14  ;;  %1022 = vmatpush1.bf16.msra.mxu1 %v1331_v15  ;;  %v149_v15 = vrot.slane %v140_v8, %v148_v9 }
  0x7f   :  { %982 = vmatprep.subr.bf16.mxu0 %v1336_v16  ;;  %1023 = vmatprep.subr.bf16.mxu1 %v1339_v17  ;;  %v157_v16 = vrot.slane %v140_v8, %v156_v10 }
  0x82   :  { %983 = vmatpush1.bf16.msra.mxu0 %v1334_v18  ;;  %1024 = vmatpush1.bf16.msra.mxu1 %v1337_v19 }
  0x83   :  { %984 = vmatprep.subr.bf16.mxu0 %v1342_v20  ;;  %1025 = vmatprep.subr.bf16.mxu1 %v1345_v21 }
  0x86   :  { %985 = vmatpush1.bf16.msra.mxu0 %v1340_v22  ;;  %1026 = vmatpush1.bf16.msra.mxu1 %v1343_v23 }
  0x87   :  { %986 = vmatprep.subr.bf16.mxu0 %v1348_v24  ;;  %1027 = vmatprep.subr.bf16.mxu1 %v1351_v25 }
  0x8a   :  { %987 = vmatpush1.bf16.msra.mxu0 %v1346_v26  ;;  %1028 = vmatpush1.bf16.msra.mxu1 %v1349_v27 }
  0x8b   :  { %988 = vmatprep.subr.bf16.mxu0 %v1354_v28  ;;  %1029 = vmatprep.subr.bf16.mxu1 %v1357_v29 }
  0x8e   :  { %989 = vmatpush1.bf16.msra.mxu0 %v1352_v30  ;;  %1030 = vmatpush1.bf16.msra.mxu1 %v1355_v31 }
  0x8f   :  { %990 = vmatprep.subr.bf16.mxu0 %v1360_v32  ;;  %1031 = vmatprep.subr.bf16.mxu1 %v1363_v33 }
  0x92   :  { %991 = vmatpush1.bf16.msra.mxu0 %v1358_v34  ;;  %1032 = vmatpush1.bf16.msra.mxu1 %v1361_v35 }
  0x93   :  { %992 = vmatprep.subr.bf16.mxu0 %v1366_v36  ;;  %1033 = vmatprep.subr.bf16.mxu1 %v1369_v37 }
  0x96   :  { %993 = vmatpush2.bf16.msra.mxu0 %v1364_v38  ;;  %1034 = vmatpush2.bf16.msra.mxu1 %v1367_v39  ;;  %v644_v39 = vld [vmem:[%s1581_s4] sm:$0x3]  ;;  %s1492_s4 = scalar_lea.vmem %s1073_s16, 256 }
  0x97   :  { %994 = vmatprep.subr.bf16.mxu0 %v1372_v40  ;;  %1035 = vmatprep.subr.bf16.mxu1 %v1375_v41  ;;  %v649_v40 = vrot.slane %v644_v39, %v144_v6  ;;  %v653_v41 = vrot.slane %v644_v39, %v148_v9  ;;  %p1493_p6 = scmp.ne.s32.totalorder %s1073_s16, %s1492_s4  ;;  %p1498_p8 = scmp.lt.s32.totalorder %s1492_s4, %s1492_s4 }
  0x99   :  { %p1499_p9 = por %p1498_p8, %p1497_p7 }
  0x9a   :  { %995 = vmatpush2.bf16.msra.mxu0 %v1370_v42  ;;  %1036 = vmatpush2.bf16.msra.mxu1 %v1373_v43 }
  0x9b   :  { %996 = vmatprep.subr.bf16.mxu0 %v1378_v44  ;;  %1037 = vmatprep.subr.bf16.mxu1 %v1381_v45  ;;  %p1500_p10 = pnand %p1499_p9, %p1493_p6 }
  0x9e   :  { %997 = vmatpush2.bf16.msra.mxu0 %v1376_v46  ;;  %1038 = vmatpush2.bf16.msra.mxu1 %v1379_v47 }
  0x9f   :  { %998 = vmatprep.subr.bf16.mxu0 %v1384_v48  ;;  %1039 = vmatprep.subr.bf16.mxu1 %v1387_v49 }
  0xa2   :  { %999 = vmatpush2.bf16.msra.mxu0 %v1382_v50  ;;  %1040 = vmatpush2.bf16.msra.mxu1 %v1385_v51 }
  0xa3   :  { %1000 = vmatprep.subr.bf16.mxu0 %v1390_v52  ;;  %1041 = vmatprep.subr.bf16.mxu1 %v1393_v53 }
  0xa6   :  { %1001 = vmatpush2.bf16.msra.mxu0 %v1388_v54  ;;  %1042 = vmatpush2.bf16.msra.mxu1 %v1391_v55 }
  0xa7   :  { %1002 = vmatprep.subr.bf16.mxu0 %v1396_v56  ;;  %1043 = vmatprep.subr.bf16.mxu1 %v1399_v57 }
  0xaa   :  { %1003 = vmatpush2.bf16.msra.mxu0 %v1394_v58  ;;  %1044 = vmatpush2.bf16.msra.mxu1 %v1397_v59 }
  0xab   :  { %1004 = vmatprep.subr.bf16.mxu0 %v1402_v60  ;;  %1045 = vmatprep.subr.bf16.mxu1 %v1405_v61 }
  0xae   :  { %1005 = vmatpush2.bf16.msra.mxu0 %v1400_v62  ;;  %1046 = vmatpush2.bf16.msra.mxu1 %v1403_v63 }
  0xaf   :  { %1006 = vmatprep.subr.bf16.mxu0 %v1408_v1  ;;  %1047 = vmatprep.subr.bf16.mxu1 %v1411_v3 }
  0xb2   :  { %1007 = vmatpush2.bf16.msra.mxu0 %v1406_v0  ;;  %1048 = vmatpush2.bf16.msra.mxu1 %v1409_v2 }
 0x135   :  { %v516_v13 = vpop.f32.mrf.mxu0  ;;  %v557_v14 = vpop.f32.mrf.mxu1 }
 0x136   :  { %v517_v17 = vadd.f32 %v516_v13, %v145_v11  ;;  %v558_v18 = vadd.f32 %v557_v14, %v153_v12 }
 0x137   :  { %v518_v19 = vpop.f32.mrf.mxu0  ;;  %v559_v20 = vpop.f32.mrf.mxu1 }
 0x138   :  { %v568_v21 = vmul.f32 0.01, %v517_v17  ;;  %vm564_vm0 = vcmp.ge.f32.partialorder %v517_v17, 0.0  ;;  %v570_v22 = vmul.f32 0.01, %v558_v18  ;;  %v519_v23 = vadd.f32 %v518_v19, %v149_v15 }
 0x139   :  { %v560_v24 = vadd.f32 %v559_v20, %v157_v16  ;;  %v520_v25 = vpop.f32.mrf.mxu0  ;;  %v561_v26 = vpop.f32.mrf.mxu1  ;;  %vm566_vm1 = vcmp.ge.f32.partialorder %v558_v18, 0.0 }
 0x13a   :  { %vm565_vm2 = vcmp.ge.f32.partialorder %v519_v23, 0.0  ;;  %v569_v27 = vmul.f32 0.01, %v519_v23  ;;  %v572_v30 = vsel %vm564_vm0, %v517_v17, %v568_v21  ;;  %v574_v32 = vsel %vm566_vm1, %v558_v18, %v570_v22 }
 0x13b   :  { %v521_v28 = vpop.f32.mrf.mxu0  ;;  %v562_v29 = vpop.f32.mrf.mxu1  ;;  %vm567_vm3 = vcmp.ge.f32.partialorder %v560_v24, 0.0  ;;  %v571_v31 = vmul.f32 0.01, %v560_v24  ;;  %v576_v36 = vpack.c.bf16 %v572_v30, %v572_v30  ;;  %v578_v38 = vpack.c.bf16 %v574_v32, %v574_v32 }
 0x13c   :  { %v573_v33 = vsel %vm565_vm2, %v519_v23, %v569_v27 }
 0x13d   :  { %v577_v34 = vpack.c.bf16 %v573_v33, %v573_v33  ;;  %v575_v35 = vsel %vm567_vm3, %v560_v24, %v571_v31 }
 0x13e   :  { %v579_v37 = vpack.c.bf16 %v575_v35, %v575_v35 }
 0x13f   :  { %1008 = vmatprep.mubr.bf16.mxu0 %v577_v34 }
 0x140   :  { %1049 = vmatprep.mubr.bf16.mxu1 %v579_v37  ;;  %1009 = vmatmul.mubr.bf16.vlgmr.msra.gmra.mxu0 %v576_v36 }
 0x141   :  { %1050 = vmatmul.mubr.bf16.vlgmr.msra.gmra.mxu1 %v578_v38 }
 0x200   :  { %v1010_v42 = vpop.f32.mrf.mxu0 }
 0x201   :  { %v1011_v43 = vadd.f32 %v1010_v42, %v649_v40  ;;  %v1051_v44 = vpop.f32.mrf.mxu1 }
 0x202   :  { %v1012_v45 = vpop.f32.mrf.mxu0 }
 0x203   :  { %v1052_v46 = vadd.f32 %v1051_v44, %v1011_v43  ;;  %v1013_v47 = vadd.f32 %v1012_v45, %v653_v41  ;;  %v1053_v48 = vpop.f32.mrf.mxu1 }
 0x204   :  { %v1014_v49 = vpop.f32.mrf.mxu0 }
 0x205   :  { %vm1058_vm4 = vcmp.ge.f32.partialorder %v1052_v46, 0.0  ;;  %v1060_v50 = vmul.f32 0.01, %v1052_v46  ;;  %v1054_v51 = vadd.f32 %v1053_v48, %v1013_v47  ;;  %v1055_v52 = vpop.f32.mrf.mxu1 }
 0x206   :  { %v1015_v53 = vpop.f32.mrf.mxu0 }
 0x207   :  { %vm1059_vm5 = vcmp.ge.f32.partialorder %v1054_v51, 0.0  ;;  %v1061_v54 = vmul.f32 0.01, %v1054_v51  ;;  %v1056_v55 = vpop.f32.mrf.mxu1  ;;  %v1062_v56 = vsel %vm1058_vm4, %v1052_v46, %v1060_v50 }
 0x208   :  { %1064 = vst [vmem:[#allocation10] sm:$0xff] %v1062_v56 }
 0x209   :  { %v1063_v57 = vsel %vm1059_vm5, %v1054_v51, %v1061_v54 }
 0x20a   :  { %1065 = vst [vmem:[#allocation10 + $0x8] sm:$0xff] %v1063_v57 }
 0x20b   :  { %1503 = shalt.err (!%p1500_p10)
}
 0x20c   :  { %1075 = dma.vmem_to_hbm [thread:$0]  %s1073_s16, 256, %s1582_s5, [#allocation4]  }
 0x20d   :  { %1518 = dma.done.wait [#allocation4], 256  }
 0x20e   :  { %1519 = vsyncadd [#allocation4], 4294967040 }
 0x20f   :  { %1079 = vsyncpa [#allocation3], 1 }
 0x210   :  { %1080 = vsyncpa [#allocation6], 1 }
 0x211   :  { %1081 = vsyncpa [#allocation9], 1 }
 0x212   :  { %1082 = vsyncpa [#allocation4], 1 }

</bundles_post_ra>
